<compile_context>
chip_gen: v7x
topology: tpu7x:2x2x1
jax: 0.10.0
libtpu: 0.0.40
codegen_flags: <defaults>
</compile_context>

<pallas_src>
import numpy as np
import jax
import jax.numpy as jnp
from jax.experimental import pallas as pl
from jax.experimental.pallas import tpu as pltpu

LANE = 128


def gat_kernel(x_ref, adj_ref, w_ref, a1_ref, a2_ref, fcw_ref, fcb_ref, out_ref):
    Gb, N, D = x_ref.shape
    Fp = w_ref.shape[1]

    # ---- GraphAttentionLayer: node projection for all Gb graphs in ONE MXU pass ----
    x_flat = x_ref[...].reshape(Gb * N, D)                                    # (Gb*N, D)
    h_flat = jnp.dot(x_flat, w_ref[...],
                     preferred_element_type=jnp.float32)                      # (Gb*N, F')
    h = h_flat.reshape(Gb, N, Fp)                                             # (Gb, N, F')

    # attention logits: e[g,i,j] = LeakyReLU(a1·h_i + a2·h_j)
    f1 = jnp.dot(h_flat, a1_ref[...], preferred_element_type=jnp.float32)     # (Gb*N, 1)
    f2 = jnp.dot(h_flat, a2_ref[...], preferred_element_type=jnp.float32)     # (Gb*N, 1)
    f1 = f1.reshape(Gb, N, 1)                                                 # (Gb, N, 1)
    f2 = jnp.swapaxes(f2.reshape(Gb, N, 1), 1, 2)                             # (Gb, 1, N)
    e = f1 + f2                                                               # (Gb, N, N)
    e = jnp.where(e > 0, e, 0.2 * e)                                          # LeakyReLU(0.2)

    # mask non-edges with -9e15 (pyGAT reference), then row softmax
    adj_f = adj_ref[...].astype(jnp.float32)                                  # int8 mask -> f32
    e = jnp.where(adj_f > 0, e, jnp.full_like(e, -9e15))
    m = jnp.max(e, axis=-1, keepdims=True)
    p = jnp.exp(e - m)
    s = jnp.sum(p, axis=-1, keepdims=True)
    attn = p * pl.reciprocal(s, approx=False)                                 # (Gb, N, N)

    # h' = attn @ h per graph; concat=True -> ELU
    h_prime = jnp.einsum('gij,gjf->gif', attn, h,
                         preferred_element_type=jnp.float32)                  # (Gb, N, F')
    out_nodes = jnp.where(h_prime > 0, h_prime,
                          jnp.exp(jnp.minimum(h_prime, 0.0)) - 1.0)           # ELU

    # ---- dgl.sum_nodes per graph ----
    sum_node = jnp.sum(out_nodes, axis=1)                                     # (Gb, F')

    # ---- classification head (classes lane-padded to 128 -> dense (Gb,128) store) ----
    logits = jnp.dot(sum_node, fcw_ref[...],
                     preferred_element_type=jnp.float32) + fcb_ref[...]       # (Gb, Cpad)
    out_ref[...] = logits


def gat_forward(x, adj, W, a1, a2, fc_w, fc_b, graphs_per_step=None):
    """Batched GAT forward.

    x:    (B, N, D)   node features per graph
    adj:  (B, N, N)   dense normalized adjacency per graph (used only as >0 mask)
    W:    (D, F'),  a1/a2: (F', 1),  fc_w: (F', C),  fc_b: (1, C) or (C,)
    returns (B, C) logits
    """
    B, N, D = x.shape
    Fp = W.shape[1]
    C = fc_w.shape[1]

    if graphs_per_step is None:
        # Batch as many graphs per grid step as possible while keeping >= 2
        # grid steps so the "parallel" axis can shard across v7x's 2 TensorCores.
        graphs_per_step = B if B < 2 else B // 2
    Gb = graphs_per_step
    assert B % Gb == 0, "batch must be divisible by graphs_per_step"

    # Lane-dense classifier output: pad classes up to a multiple of 128.
    c_pad = max(LANE, ((C + LANE - 1) // LANE) * LANE)
    fcw_pad = jnp.zeros((Fp, c_pad), jnp.float32).at[:, :C].set(fc_w)
    fcb_pad = jnp.zeros((1, c_pad), jnp.float32).at[:, :C].set(
        jnp.reshape(fc_b, (1, C)))

    # Adjacency is only consulted as a >0 mask -> ship it as int8 (4x less DMA).
    adj_mask = (adj > 0).astype(jnp.int8)

    out = pl.pallas_call(
        gat_kernel,
        out_shape=jax.ShapeDtypeStruct((B, c_pad), jnp.float32),
        grid_spec=pltpu.PrefetchScalarGridSpec(
            num_scalar_prefetch=0,
            grid=(B // Gb,),
            in_specs=[
                pl.BlockSpec((Gb, N, D), lambda b: (b, 0, 0)),      # x (Gb graphs)
                pl.BlockSpec((Gb, N, N), lambda b: (b, 0, 0)),      # adj mask (int8)
                pl.BlockSpec((D, Fp), lambda b: (0, 0)),            # W (VMEM resident)
                pl.BlockSpec((Fp, 1), lambda b: (0, 0)),            # a1
                pl.BlockSpec((Fp, 1), lambda b: (0, 0)),            # a2
                pl.BlockSpec((Fp, c_pad), lambda b: (0, 0)),        # fc W (padded)
                pl.BlockSpec((1, c_pad), lambda b: (0, 0)),         # fc b (padded)
            ],
            out_specs=pl.BlockSpec((Gb, c_pad), lambda b: (b, 0)),  # (Gb, 128) slab
        ),
        compiler_params=pltpu.CompilerParams(
            dimension_semantics=("parallel",)),
    )(x, adj_mask, W, a1, a2, fcw_pad, fcb_pad)

    return out[:, :C]


def gat_reference(x, adj, W, a1, a2, fc_w, fc_b):
    """Pure-JAX reference for correctness checking."""
    h = jnp.einsum("bnd,df->bnf", x, W)
    f1 = jnp.einsum("bnf,fo->bno", h, a1)          # (B, N, 1)
    f2 = jnp.einsum("bnf,fo->bno", h, a2)          # (B, N, 1)
    e = f1 + jnp.swapaxes(f2, 1, 2)                # (B, N, N)
    e = jnp.where(e > 0, e, 0.2 * e)
    e = jnp.where(adj > 0, e, -9e15)
    attn = jax.nn.softmax(e, axis=-1)
    h_prime = jnp.einsum("bnm,bmf->bnf", attn, h)
    out_nodes = jnp.where(h_prime > 0, h_prime, jnp.exp(h_prime) - 1.0)
    sum_node = jnp.sum(out_nodes, axis=1)          # (B, F')
    return sum_node @ fc_w + jnp.reshape(fc_b, (1, -1))


def build_normalized_adj(n_nodes, edges_src, edges_dst):
    """Mimic the module's adjacency preprocessing (symmetrize + D^-1/2 (A+I) D^-1/2)."""
    adj = np.zeros((n_nodes, n_nodes), dtype=np.float32)
    for s, d in zip(edges_src, edges_dst):
        adj[s, d] = 1.0
    # symmetrize: adj + adj.T * (adj.T > adj) - adj * (adj.T > adj)
    adj = adj + adj.T * (adj.T > adj) - adj * (adj.T > adj)
    adj = adj + np.eye(n_nodes, dtype=np.float32)          # self loops
    deg = adj.sum(axis=1)
    d_inv_sqrt = 1.0 / np.sqrt(np.maximum(deg, 1e-12))
    adj = adj * d_inv_sqrt[:, None] * d_inv_sqrt[None, :]
    return adj.astype(np.float32)


if __name__ == "__main__":
    # Small synthetic batch consistent with the module's __init__:
    #   n_entities = 8 -> node_dim = 2 * 8 = 16
    #   n_hidden_gat = 8, n_heads_gat = 1, n_classes = 4
    B = 16            # number of graphs -> 2 grid steps of 8 graphs each
    N = 16            # nodes per graph
    node_dim = 16     # 2 * n_entities
    hidden = 8        # n_hidden_gat
    n_classes = 4

    key = jax.random.PRNGKey(0)
    k_x, k_e, k_w, k_a, k_fw, k_fb = jax.random.split(key, 6)

    # node features (GNN_NODE_LABELS_KEY), one (N, D) slab per graph
    x = jax.random.normal(k_x, (B, N, node_dim), dtype=jnp.float32)

    # deterministic random edge lists per graph, preprocessed like the module
    n_edges = 32
    adj_np = np.zeros((B, N, N), dtype=np.float32)
    ekeys = jax.random.split(k_e, 2 * B)
    for b in range(B):
        src = np.asarray(jax.random.randint(ekeys[2 * b], (n_edges,), 0, N))
        dst = np.asarray(jax.random.randint(ekeys[2 * b + 1], (n_edges,), 0, N))
        adj_np[b] = build_normalized_adj(N, src, dst)
    adj = jnp.asarray(adj_np)

    # GAT layer params (W: (node_dim, hidden), a: (2*hidden, 1) split into a1/a2)
    W = jax.random.normal(k_w, (node_dim, hidden), dtype=jnp.float32) * 0.1
    a_full = jax.random.normal(k_a, (2 * hidden, 1), dtype=jnp.float32) * 0.1
    a1 = a_full[:hidden, :]          # (hidden, 1)
    a2 = a_full[hidden:, :]          # (hidden, 1)

    # classification head: Linear(hidden * n_heads, n_classes)
    fc_w = jax.random.normal(k_fw, (hidden, n_classes), dtype=jnp.float32) * 0.1
    fc_b = jax.random.normal(k_fb, (1, n_classes), dtype=jnp.float32) * 0.01

    # TODO(synk): training-time F.dropout / attention dropout are identity here
    # (eval-mode forward only); stochastic dropout is not implemented in-kernel.
    out = gat_forward(x, adj, W, a1, a2, fc_w, fc_b)
    out = jax.block_until_ready(out)
    assert out.shape == (B, n_classes)

    ref = gat_reference(x, adj, W, a1, a2, fc_w, fc_b)
    assert np.allclose(np.asarray(out), np.asarray(ref), rtol=1e-2, atol=1e-3), (
        "kernel output mismatch vs reference")

    print("KERNEL_OK")
</pallas_src>

<mosaic_0001>
module attributes {stable_mosaic.version = 11 : i64} {
  func.func @gat_kernel(%arg0: i32, %arg1: memref<8x16x16xf32, #tpu.memory_space<vmem>>, %arg2: memref<8x16x16xi8, #tpu.memory_space<vmem>>, %arg3: memref<16x8xf32, #tpu.memory_space<vmem>>, %arg4: memref<8x1xf32, #tpu.memory_space<vmem>>, %arg5: memref<8x1xf32, #tpu.memory_space<vmem>>, %arg6: memref<8x128xf32, #tpu.memory_space<vmem>>, %arg7: memref<1x128xf32, #tpu.memory_space<vmem>>, %arg8: memref<8x128xf32, #tpu.memory_space<vmem>>) attributes {dimension_semantics = [#tpu.dimension_semantics<parallel>], iteration_bounds = array<i64: 2>, scalar_prefetch = 0 : i64, scratch_operands = 0 : i64, tpu.core_type = #tpu.core_type<tc>, window_params = [{transform_indices = @transform_0, window_bounds = array<i64: 8, 16, 16>}, {transform_indices = @transform_1, window_bounds = array<i64: 8, 16, 16>}, {pipeline_mode = #tpu.pipeline_mode<synchronous>, transform_indices = @transform_2, window_bounds = array<i64: 16, 8>}, {pipeline_mode = #tpu.pipeline_mode<synchronous>, transform_indices = @transform_3, window_bounds = array<i64: 8, 1>}, {pipeline_mode = #tpu.pipeline_mode<synchronous>, transform_indices = @transform_4, window_bounds = array<i64: 8, 1>}, {pipeline_mode = #tpu.pipeline_mode<synchronous>, transform_indices = @transform_5, window_bounds = array<i64: 8, 128>}, {pipeline_mode = #tpu.pipeline_mode<synchronous>, transform_indices = @transform_6, window_bounds = array<i64: 1, 128>}, {transform_indices = @transform_7, window_bounds = array<i64: 8, 128>}]} {
    %c0 = arith.constant 0 : index
    %c0_0 = arith.constant 0 : index
    %c0_1 = arith.constant 0 : index
    %0 = vector.load %arg1[%c0, %c0_0, %c0_1] : memref<8x16x16xf32, #tpu.memory_space<vmem>>, vector<8x16x16xf32>
    %1 = vector.shape_cast %0 : vector<8x16x16xf32> to vector<128x16xf32>
    %c0_2 = arith.constant 0 : index
    %c0_3 = arith.constant 0 : index
    %2 = vector.load %arg3[%c0_2, %c0_3] : memref<16x8xf32, #tpu.memory_space<vmem>>, vector<16x8xf32>
    %cst = arith.constant dense<0.000000e+00> : vector<128x8xf32>
    %3 = tpu.matmul %1, %2, %cst {dimension_numbers = #tpu.dot_dimension_numbers<[1], [0], [0], [1], [0, 0, 1, 1], [], []>} : vector<128x16xf32>, vector<16x8xf32>, vector<128x8xf32> -> vector<128x8xf32>
    %4 = vector.shape_cast %3 : vector<128x8xf32> to vector<8x16x8xf32>
    %c0_4 = arith.constant 0 : index
    %c0_5 = arith.constant 0 : index
    %5 = vector.load %arg4[%c0_4, %c0_5] : memref<8x1xf32, #tpu.memory_space<vmem>>, vector<8x1xf32>
    %cst_6 = arith.constant dense<0.000000e+00> : vector<128x1xf32>
    %6 = tpu.matmul %3, %5, %cst_6 {dimension_numbers = #tpu.dot_dimension_numbers<[1], [0], [0], [1], [0, 0, 1, 1], [], []>} : vector<128x8xf32>, vector<8x1xf32>, vector<128x1xf32> -> vector<128x1xf32>
    %c0_7 = arith.constant 0 : index
    %c0_8 = arith.constant 0 : index
    %7 = vector.load %arg5[%c0_7, %c0_8] : memref<8x1xf32, #tpu.memory_space<vmem>>, vector<8x1xf32>
    %cst_9 = arith.constant dense<0.000000e+00> : vector<128x1xf32>
    %8 = tpu.matmul %3, %7, %cst_9 {dimension_numbers = #tpu.dot_dimension_numbers<[1], [0], [0], [1], [0, 0, 1, 1], [], []>} : vector<128x8xf32>, vector<8x1xf32>, vector<128x1xf32> -> vector<128x1xf32>
    %9 = vector.shape_cast %6 : vector<128x1xf32> to vector<8x16x1xf32>
    %10 = vector.shape_cast %8 : vector<128x1xf32> to vector<8x16x1xf32>
    %11 = tpu.transpose %10, [0, 2, 1] : vector<8x16x1xf32> -> vector<8x1x16xf32>
    %12 = vector.broadcast %9 : vector<8x16x1xf32> to vector<8x16x16xf32>
    %13 = vector.broadcast %11 : vector<8x1x16xf32> to vector<8x16x16xf32>
    %14 = arith.addf %12, %13 : vector<8x16x16xf32>
    %cst_10 = arith.constant 0.000000e+00 : f32
    %15 = vector.broadcast %cst_10 : f32 to vector<8x16x16xf32>
    %16 = arith.cmpf ogt, %14, %15 : vector<8x16x16xf32>
    %cst_11 = arith.constant 2.000000e-01 : f32
    %17 = vector.broadcast %cst_11 : f32 to vector<8x16x16xf32>
    %18 = arith.mulf %17, %14 : vector<8x16x16xf32>
    %19 = arith.select %16, %14, %18 : vector<8x16x16xi1>, vector<8x16x16xf32>
    %c0_12 = arith.constant 0 : index
    %c0_13 = arith.constant 0 : index
    %c0_14 = arith.constant 0 : index
    %20 = vector.load %arg2[%c0_12, %c0_13, %c0_14] : memref<8x16x16xi8, #tpu.memory_space<vmem>>, vector<8x16x16xi8>
    %21 = arith.sitofp %20 : vector<8x16x16xi8> to vector<8x16x16xf32>
    %cst_15 = arith.constant 0.000000e+00 : f32
    %22 = vector.broadcast %cst_15 : f32 to vector<8x16x16xf32>
    %23 = arith.cmpf ogt, %21, %22 : vector<8x16x16xf32>
    %cst_16 = arith.constant -9.000000e+15 : f32
    %24 = vector.broadcast %cst_16 : f32 to vector<8x16x16xf32>
    %25 = arith.select %23, %19, %24 : vector<8x16x16xi1>, vector<8x16x16xf32>
    %cst_17 = arith.constant dense<0xFF800000> : vector<8x16xf32>
    %26 = vector.multi_reduction <maximumf>, %25, %cst_17 [2] : vector<8x16x16xf32> to vector<8x16xf32>
    %27 = vector.shape_cast %26 : vector<8x16xf32> to vector<8x16x1xf32>
    %28 = vector.broadcast %27 : vector<8x16x1xf32> to vector<8x16x16xf32>
    %29 = arith.subf %25, %28 : vector<8x16x16xf32>
    %30 = math.exp %29 : vector<8x16x16xf32>
    %cst_18 = arith.constant dense<0.000000e+00> : vector<8x16xf32>
    %31 = vector.multi_reduction <add>, %30, %cst_18 [2] : vector<8x16x16xf32> to vector<8x16xf32>
    %32 = vector.shape_cast %31 : vector<8x16xf32> to vector<8x16x1xf32>
    %33 = tpu.reciprocal %32 : vector<8x16x1xf32> -> vector<8x16x1xf32>
    %34 = vector.broadcast %33 : vector<8x16x1xf32> to vector<8x16x16xf32>
    %35 = arith.mulf %30, %34 : vector<8x16x16xf32>
    "tpu.trace_start"() <{level = 10 : i32, message = "gij,gjf->gif"}> : () -> ()
    %cst_19 = arith.constant dense<0.000000e+00> : vector<8x16x8xf32>
    %36 = tpu.matmul %35, %4, %cst_19 {dimension_numbers = #tpu.dot_dimension_numbers<[2], [1], [1], [2], [0, 0, 0, 1, 1, 2], [0], [0]>} : vector<8x16x16xf32>, vector<8x16x8xf32>, vector<8x16x8xf32> -> vector<8x16x8xf32>
    %cst_20 = arith.constant 0.000000e+00 : f32
    "tpu.trace_stop"() : () -> ()
    %37 = vector.broadcast %cst_20 : f32 to vector<8x16x8xf32>
    %38 = arith.cmpf ogt, %36, %37 : vector<8x16x8xf32>
    %cst_21 = arith.constant 0.000000e+00 : f32
    %39 = vector.broadcast %cst_21 : f32 to vector<8x16x8xf32>
    %40 = arith.minimumf %36, %39 : vector<8x16x8xf32>
    %41 = math.exp %40 : vector<8x16x8xf32>
    %cst_22 = arith.constant 1.000000e+00 : f32
    %42 = vector.broadcast %cst_22 : f32 to vector<8x16x8xf32>
    %43 = arith.subf %41, %42 : vector<8x16x8xf32>
    %44 = arith.select %38, %36, %43 : vector<8x16x8xi1>, vector<8x16x8xf32>
    %cst_23 = arith.constant dense<0.000000e+00> : vector<8x8xf32>
    %45 = vector.multi_reduction <add>, %44, %cst_23 [1] : vector<8x16x8xf32> to vector<8x8xf32>
    %c0_24 = arith.constant 0 : index
    %c0_25 = arith.constant 0 : index
    %46 = vector.load %arg6[%c0_24, %c0_25] : memref<8x128xf32, #tpu.memory_space<vmem>>, vector<8x128xf32>
    %cst_26 = arith.constant dense<0.000000e+00> : vector<8x128xf32>
    %47 = tpu.matmul %45, %46, %cst_26 {dimension_numbers = #tpu.dot_dimension_numbers<[1], [0], [0], [1], [0, 0, 1, 1], [], []>} : vector<8x8xf32>, vector<8x128xf32>, vector<8x128xf32> -> vector<8x128xf32>
    %c0_27 = arith.constant 0 : index
    %c0_28 = arith.constant 0 : index
    %48 = vector.load %arg7[%c0_27, %c0_28] : memref<1x128xf32, #tpu.memory_space<vmem>>, vector<1x128xf32>
    %49 = vector.broadcast %48 : vector<1x128xf32> to vector<8x128xf32>
    %50 = arith.addf %47, %49 : vector<8x128xf32>
    %c0_29 = arith.constant 0 : index
    %c0_30 = arith.constant 0 : index
    %51 = vector.load %arg8[%c0_29, %c0_30] : memref<8x128xf32, #tpu.memory_space<vmem>>, vector<8x128xf32>
    tpu.vector_store %arg8[%c0_29, %c0_30], %50 {strides = array<i32>} : memref<8x128xf32, #tpu.memory_space<vmem>>, vector<8x128xf32>,
    return
  }
  func.func @transform_0(%arg0: i32) -> (i32, i32, i32) {
    %c0_i32 = arith.constant 0 : i32
    %c0_i32_0 = arith.constant 0 : i32
    %c0_i32_1 = arith.constant 0 : i32
    return %arg0, %c0_i32, %c0_i32_0 : i32, i32, i32
  }
  func.func @transform_1(%arg0: i32) -> (i32, i32, i32) {
    %c0_i32 = arith.constant 0 : i32
    %c0_i32_0 = arith.constant 0 : i32
    %c0_i32_1 = arith.constant 0 : i32
    return %arg0, %c0_i32, %c0_i32_0 : i32, i32, i32
  }
  func.func @transform_2(%arg0: i32) -> (i32, i32) {
    %c0_i32 = arith.constant 0 : i32
    %c0_i32_0 = arith.constant 0 : i32
    %c0_i32_1 = arith.constant 0 : i32
    return %c0_i32, %c0_i32_0 : i32, i32
  }
  func.func @transform_3(%arg0: i32) -> (i32, i32) {
    %c0_i32 = arith.constant 0 : i32
    %c0_i32_0 = arith.constant 0 : i32
    %c0_i32_1 = arith.constant 0 : i32
    return %c0_i32, %c0_i32_0 : i32, i32
  }
  func.func @transform_4(%arg0: i32) -> (i32, i32) {
    %c0_i32 = arith.constant 0 : i32
    %c0_i32_0 = arith.constant 0 : i32
    %c0_i32_1 = arith.constant 0 : i32
    return %c0_i32, %c0_i32_0 : i32, i32
  }
  func.func @transform_5(%arg0: i32) -> (i32, i32) {
    %c0_i32 = arith.constant 0 : i32
    %c0_i32_0 = arith.constant 0 : i32
    %c0_i32_1 = arith.constant 0 : i32
    return %c0_i32, %c0_i32_0 : i32, i32
  }
  func.func @transform_6(%arg0: i32) -> (i32, i32) {
    %c0_i32 = arith.constant 0 : i32
    %c0_i32_0 = arith.constant 0 : i32
    %c0_i32_1 = arith.constant 0 : i32
    return %c0_i32, %c0_i32_0 : i32, i32
  }
  func.func @transform_7(%arg0: i32) -> (i32, i32) {
    %c0_i32 = arith.constant 0 : i32
    %c0_i32_0 = arith.constant 0 : i32
    return %arg0, %c0_i32 : i32, i32
  }
}

</mosaic_0001>

<bundles_post_ra>
// kernel: tpu_custom_call.1
= control target key start
LH: loop header
LB: loop body
LE: loop exit
PB: predicated region body
PF: predicated region fallthrough
CT: control target
= control target key end

     0   :  { %s4042_s0 = inlined_call_operand.hbm [shape: f32[16,16,16], index: 0, kind: input, shape index: {}]   ;;  %s4043_s1 = inlined_call_operand.hbm [shape: s8[16,16,16], index: 1, kind: input, shape index: {}]   ;;  %s4044_s2 = inlined_call_operand.vmem [shape: f32[16,8], index: 2, kind: input, shape index: {}]   ;;  %s4045_s3 = inlined_call_operand.vmem [shape: f32[8,1], index: 3, kind: input, shape index: {}]   ;;  %s4046_s4 = inlined_call_operand.vmem [shape: f32[8,1], index: 4, kind: input, shape index: {}]   ;;  %s4047_s5 = inlined_call_operand.vmem [shape: f32[8,128], index: 5, kind: input, shape index: {}]   ;;  %s4048_s6 = inlined_call_operand.vmem [shape: f32[1,128], index: 6, kind: input, shape index: {}]   ;;  %s4049_s7 = inlined_call_operand.hbm [shape: f32[16,128], index: 7, kind: output, shape index: {}]  }
   0x1   :  { %4052 = sst [smem:[#allocation12_spill]] %s4042_s0 }
   0x2   :  { %12 = vsyncpa [#allocation3], 0 }
   0x3   :  { %14 = vsyncpa [#allocation3 + $0x1], 0 }
   0x4   :  { %15 = vsyncpa [#allocation6], 0 }
   0x5   :  { %17 = vsyncpa [#allocation6 + $0x1], 0 }
   0x6   :  { %18 = vsyncpa [#allocation4], 0 }
   0x7   :  { %20 = vsyncpa [#allocation4 + $0x1], 0  ;;  %s3353_s24 = smov 0   ;;  %s3355_s25 = smov 0  }
   0x8   :  { %s3357_s26 = smov 0   ;;  %s3359_s27 = smov 0  }
   0x9 LB: > { %s3374_s28 = sadd.s32 4294967295, %s3301_s27   ;;  %s2608_s29 = sadd.s32 4294967294, %s3301_s27   ;;  %s3301_s27 = sphi %s3359_s27, %s4069_s27   ;;  %s3297_s26 = sphi %s3357_s26, %s4068_s26   ;;  %s3293_s25 = sphi %s3355_s25, %s4067_s25   ;;  %s3289_s24 = sphi %s3353_s24, %s4066_s24  }
   0xa   : > { %s3378_s30 = sadd.s32 1, %s3301_s27   ;;  %s33_s8 = sadd.s32 1, %s3297_s26 }
   0xb   : > { %s30_s9 = ssub.s32 %s3301_s27, %s3378_s30  ;;  %p40_p0 = scmp.ne.s32.totalorder %s3297_s26, %s3293_s25 }
   0xc   : > { %p31_p1 = scmp.eq.s32.totalorder %s30_s9, 0  ;;  %p41_p2 = scmp.eq.s32.totalorder %s3301_s27, 0 }
   0xd   : > { %p46_p3 = scmp.ne.s32.totalorder %s3293_s25, %s3289_s24  ;;  %p47_p4 = scmp.eq.s32.totalorder %s3374_s28, 0 }
   0xe   : > { %s3390_s10 = scalar_select %p31_p1, %s3297_s26, %s33_s8  }
   0xf   : > { %p3392_p5 = por %p41_p2, %p40_p0  ;;  %p3396_p6 = por %p47_p4, %p46_p3 }
  0x10   : > { %4053 = sst [smem:[#allocation11_spill]] %s3390_s10  ;;  %p201_p7 = scmp.eq.s32.totalorder %s3374_s28, 1 }
  0x11   : > { %s4055_s12 = scalar_select %p3396_p6, 1, 0 }
  0x12   : > { %p207_p8 = scmp.eq.s32.totalorder %s2608_s29, 1  ;;  %p3032_p10 = scmp.lt.s32.totalorder %s3301_s27, 2 }
  0x13   : > { %p3403_p11 = por %p201_p7, %p40_p0  ;;  %s3412_s15 = sand.u32 1, %s3297_s26  }
  0x14   : > { %p3407_p12 = por %p207_p8, %p46_p3  ;;  %s2710_s16 = sshll.u32 %s3301_s27, 11 }
  0x15   : > { %s4056_s13 = scalar_select %p3403_p11, 1, 0 }
  0x16   : > { %s4057_s14 = scalar_select %p3407_p12, 1, 0 }
  0x17   : > { %s2611_s17 = sshll.u32 %s3412_s15, 7  ;;  %s4058_s0 = sld [smem:[#allocation12_spill]] }
  0x18   : > { %s246_s21 = scalar_lea.vmem [#allocation2], %s2611_s17  ;;  %p3423_p13 = pnand %p3032_p10, %p3392_p5 }
  0x19   : > { %s254_s22 = sshll.u32 %s246_s21, 4  ;;  %s243_s29 = scalar_lea.sflag [#allocation3], %s3412_s15  ;;  %s3427_s22 = int_to_ptr.vmem [resolvable:$true] %s254_s22 }
  0x1a   : > { %p3173_p1 = pneg %p3423_p13 }
  0x1d   : > { %s3419_s20 = scalar_lea.hbm %s4058_s0, %s2710_s16  ;;  %s3176_s11 = scalar_lea.hbm %s4058_s0, 4096 }
  0x1e   : > { %s3171_s8 = scalar_lea.hbm %s3419_s20, 2048  ;;  %p3177_p4 = scmp.lt.u32.totalorder %s3419_s20, %s4058_s0 }
  0x1f   : > { %p3172_p0 = scmp.ne.s32.totalorder %s3419_s20, %s3171_s8  ;;  %p3178_p5 = scmp.lt.u32.totalorder %s3176_s11, %s3171_s8 }
  0x20   : > { %p3180_p8 = scmp.lt.u32.totalorder %s3171_s8, %s3419_s20 }
  0x21   : > { %p3174_p2 = pnand %p3173_p1, %p3172_p0  ;;  %p3179_p7 = por %p3178_p5, %p3177_p4 }
  0x23   : > { %p3175_p3 = pneg %p3174_p2  ;;  %p3181_p10 = por %p3180_p8, %p3179_p7 }
  0x25   : > { %p3182_p9 = pnand %p3181_p10, %p3175_p3 }
  0x27   : > { %3185 = shalt.err (!%p3182_p9)
}
  0x28   : > { %s3186_s19 = scalar_lea.vmem %s3427_s22, 2048  ;;  %s3303_s21 = smov [#allocation2]  }
  0x29   : > { %p3187_p0 = scmp.ne.s32.totalorder %s3427_s22, %s3186_s19  ;;  %s3191_s9 = sshll.u32 %s3303_s21, 4  ;;  %s3192_s9 = int_to_ptr.vmem [resolvable:$false] %s3191_s9 }
  0x2a   : > { %s3193_s16 = scalar_lea.vmem %s3192_s9, 4096  ;;  %p3194_p11 = scmp.lt.s32.totalorder %s3427_s22, %s3192_s9 }
  0x2b   : > { %p3189_p2 = pnand %p3187_p0, %p3173_p1  ;;  %p3195_p4 = scmp.lt.s32.totalorder %s3193_s16, %s3186_s19 }
  0x2d   : > { %p3190_p12 = pneg %p3189_p2  ;;  %p3196_p5 = por %p3195_p4, %p3194_p11 }
  0x2f   : > { %p3197_p7 = pnand %p3196_p5, %p3190_p12 }
  0x31   : > { %3200 = shalt.err (!%p3197_p7)
}
  0x32   : > { %s3304_s8 = smov 128   ;;  %s3305_s11 = smov 8  }
  0x33   : > { %3024 = dma.hbm_to_vmem [thread:$0]  (!%p3423_p13), %s3419_s20, 2048, %s3427_s22, %s243_s29, %s3304_s8, %s3304_s8, %s3305_s11  }
  0x34   : > { %p2619_p9 = scmp.ge.s32.totalorder %s3301_s27, 1  ;;  %p284_p3 = scmp.lt.s32.totalorder %s3301_s27, 3 }
  0x35   : > { %s2615_s17 = sshll.u32 %s3412_s15, 5  ;;  %s2712_s19 = sshll.u32 %s3301_s27, 9 }
  0x36   : > { %p3460_p11 = pnand %p2619_p9, %p284_p3  ;;  %s268_s21 = scalar_lea.vmem [#allocation5], %s2615_s17 }
  0x37   : > { %s276_s9 = sshll.u32 %s268_s21, 4  ;;  %s3468_s10 = scalar_lea.hbm %s4043_s1, %s2712_s19  ;;  %s3470_s9 = int_to_ptr.vmem [resolvable:$true] %s276_s9 }
  0x38   : > { %s265_s20 = scalar_lea.sflag [#allocation6], %s3412_s15  ;;  %s3201_s22 = scalar_lea.hbm %s3468_s10, 512 }
  0x39   : > { %p3202_p12 = scmp.ne.s32.totalorder %s3468_s10, %s3201_s22  ;;  %s3206_s11 = scalar_lea.hbm %s4043_s1, 1024 }
  0x3a   : > { %p3207_p0 = scmp.lt.u32.totalorder %s3468_s10, %s4043_s1  ;;  %p3208_p2 = scmp.lt.u32.totalorder %s3206_s11, %s3201_s22 }
  0x3b   : > { %p3204_p8 = pnand %p3202_p12, %p3173_p1  ;;  %p3210_p5 = scmp.lt.u32.totalorder %s3201_s22, %s3468_s10 }
  0x3c   : > { %p3209_p4 = por %p3208_p2, %p3207_p0 }
  0x3d   : > { %p3205_p10 = pneg %p3204_p8 }
  0x3e   : > { %p3211_p7 = por %p3210_p5, %p3209_p4 }
  0x40   : > { %p3212_p9 = pnand %p3211_p7, %p3205_p10 }
  0x42   : > { %3215 = shalt.err (!%p3212_p9)
}
  0x43   : > { %s3216_s19 = scalar_lea.vmem %s3470_s9, 512  ;;  %s3306_s21 = smov [#allocation5]  }
  0x44   : > { %p3217_p3 = scmp.ne.s32.totalorder %s3470_s9, %s3216_s19  ;;  %s3221_s16 = sshll.u32 %s3306_s21, 4  ;;  %s3222_s16 = int_to_ptr.vmem [resolvable:$false] %s3221_s16 }
  0x45   : > { %s3223_s29 = scalar_lea.vmem %s3222_s16, 1024  ;;  %p3224_p6 = scmp.lt.s32.totalorder %s3470_s9, %s3222_s16 }
  0x46   : > { %p3219_p12 = pnand %p3217_p3, %p3173_p1  ;;  %p3225_p0 = scmp.lt.s32.totalorder %s3223_s29, %s3216_s19 }
  0x48   : > { %p3220_p8 = pneg %p3219_p12  ;;  %p3226_p2 = por %p3225_p0, %p3224_p6 }
  0x4a   : > { %p3227_p4 = pnand %p3226_p2, %p3220_p8 }
  0x4c   : > { %3230 = shalt.err (!%p3227_p4)
}
  0x4d   : > { %s3307_s22 = smov 32   ;;  %s3308_s8 = smov 2  }
  0x4e   : > { %3027 = dma.hbm_to_vmem [thread:$0]  (!%p3423_p13), %s3468_s10, 512, %s3470_s9, %s265_s20, %s3307_s22, %s3307_s22, %s3308_s8  }
  0x4f   : > { %288 = sbr.rel (%p3460_p11) target bundleno = 1554 (0x612), region = 48  ;;  %s3501_s11 = sand.u32 (!%p3460_p11), 1, %s3293_s25  }
  0x50   : > { %s2620_s0 = sshll.u32 (!%p3460_p11), %s3501_s11, 7  ;;  %s291_s17 = scalar_lea.sflag (!%p3460_p11), [#allocation3], %s3501_s11 }
  0x51   : > { %s3505_s19 = scalar_lea.vmem (!%p3460_p11), [#allocation2], %s2620_s0  ;;  %p4061_p6 = scmp.ne.s32.totalorder (!%p3460_p11), %s4055_s12, 0 }
  0x56   : > { %3276 = dma.done.wait (%p4061_p6), %s291_s17, 2048  }
  0x57   : > { %3278 = vsyncadd (%p4061_p6), %s291_s17, 4294965248  ;;  %s2621_s10 = sshll.u32 %s3501_s11, 5  ;;  %s300_s15 = scalar_lea.sflag [#allocation6], %s3501_s11 }
  0x58   : > { %s3513_s23 = scalar_lea.vmem [#allocation5], %s2621_s10 }
  0x59   : > { %3280 = dma.done.wait (%p4061_p6), %s300_s15, 512  }
  0x5a   : > { %3282 = vsyncadd (%p4061_p6), %s300_s15, 4294966784  ;;  %vm359_vm0 = vcmask 130048   ;;  %v357_v0 = vld [vmem:[%s4044_s2] sm:$0xff]  ;;  %v358_v1 = vld [vmem:[%s4044_s2 + $0x8] sm:$0xff]  ;;  %v3309_v21 = vmov 0   ;;  %vm554_vm1 = vcmask 64512  }
  0x5b   : > { %v341_v2 = vld [vmem:[%s3505_s19] sm:$0xff]  ;;  %v2972_v3 = vpack.c.bf16 %v358_v1, %v357_v0  ;;  %v342_v4 = vld [vmem:[%s3505_s19 + $0x8] sm:$0xff]  ;;  %v343_v5 = vld [vmem:[%s3505_s19 + $0x10] sm:$0xff]  ;;  %3073 = vset.pattern.permute.xlu0 %v3309_v21  ;;  %3074 = vset.pattern.permute.xlu1 %v3309_v21  ;;  %s2622_s17 = sshll.u32 %s3501_s11, 3  ;;  %s2706_s15 = sshll.u32 %s3374_s28, 7 }
  0x5c   : > { %2835 = vmatprep.mubr.msk.f32.mxu0 %vm359_vm0, %v341_v2  ;;  %v344_v6 = vld [vmem:[%s3505_s19 + $0x18] sm:$0xff]  ;;  %v345_v7 = vld [vmem:[%s3505_s19 + $0x20] sm:$0xff]  ;;  %v346_v8 = vld [vmem:[%s3505_s19 + $0x28] sm:$0xff]  ;;  %s3998_s21 = scalar_lea.hbm %s4049_s7, %s2706_s15  ;;  %s2502_s12 = scalar_lea.sflag [#allocation4], %s3501_s11 }
  0x5d   : > { %2973 = vmatprep.subr.bf16.mxu0 %v2972_v3  ;;  %v347_v9 = vld [vmem:[%s3505_s19 + $0x30] sm:$0xff]  ;;  %v348_v10 = vld [vmem:[%s3505_s19 + $0x38] sm:$0xff]  ;;  %v349_v11 = vld [vmem:[%s3505_s19 + $0x40] sm:$0xff]  ;;  %p4062_p1 = scmp.ne.s32.totalorder %s4056_s13, 0  ;;  %s3312_s28 = smov [#allocation7]  }
  0x5e   : > { %2975 = vmatpush3.bf16.msra.mxu0 %v2972_v3  ;;  %v350_v12 = vld [vmem:[%s3505_s19 + $0x48] sm:$0xff]  ;;  %v351_v13 = vld [vmem:[%s3505_s19 + $0x50] sm:$0xff]  ;;  %v352_v14 = vld [vmem:[%s3505_s19 + $0x58] sm:$0xff]  ;;  %s3235_s29 = sshll.u32 %s3312_s28, 4  ;;  %s3236_s29 = int_to_ptr.vmem [resolvable:$false] %s3235_s29 }
  0x5f   : > { %v353_v15 = vld [vmem:[%s3505_s19 + $0x60] sm:$0xff]  ;;  %v354_v16 = vld [vmem:[%s3505_s19 + $0x68] sm:$0xff]  ;;  %v355_v17 = vld [vmem:[%s3505_s19 + $0x70] sm:$0xff]  ;;  %s3237_s22 = scalar_lea.vmem %s3236_s29, 256 }
  0x60   : > { %v356_v18 = vld [vmem:[%s3505_s19 + $0x78] sm:$0xff]  ;;  %v553_v19 = vld [vmem:[%s4045_s3] sm:$0xff] }
  0x61   : > { %2836 = vmatmul.mubr.msk.f32.vlgmr.msra.gmra.mrb[0].mxu0 %vm359_vm0, %v342_v4  ;;  %2859 = vmatprep.subr.mxu1 %v553_v19  ;;  %v748_v20 = vld [vmem:[%s4046_s4] sm:$0xff] }
  0x62   : > { %2838 = vmatprep.mubr.msk.f32.mxu0 %vm359_vm0, %v343_v5  ;;  %2860 = vmatpush3.msra.mxu1 %v553_v19 }
  0x63   : > { %2885 = vmatprep.subr.mxu1 %v748_v20 }
  0x65   : > { %2839 = vmatmul.mubr.msk.f32.gmra.mrb[2].mxu0 %vm359_vm0, %v344_v6 }
  0x66   : > { %2841 = vmatprep.mubr.msk.f32.mxu0 %vm359_vm0, %v345_v7 }
  0x69   : > { %2842 = vmatmul.mubr.msk.f32.gmra.mrb[4].mxu0 %vm359_vm0, %v346_v8 }
  0x6a   : > { %2844 = vmatprep.mubr.msk.f32.mxu0 %vm359_vm0, %v347_v9 }
  0x6d   : > { %2845 = vmatmul.mubr.msk.f32.gmra.mrb[6].mxu0 %vm359_vm0, %v348_v10 }
  0x6e   : > { %2847 = vmatprep.mubr.msk.f32.mxu0 %vm359_vm0, %v349_v11 }
  0x71   : > { %2848 = vmatmul.mubr.msk.f32.gmra.mrb[8].mxu0 %vm359_vm0, %v350_v12 }
  0x72   : > { %2850 = vmatprep.mubr.msk.f32.mxu0 %vm359_vm0, %v351_v13 }
  0x75   : > { %2851 = vmatmul.mubr.msk.f32.gmra.mrb[10].mxu0 %vm359_vm0, %v352_v14 }
  0x76   : > { %2853 = vmatprep.mubr.msk.f32.mxu0 %vm359_vm0, %v353_v15 }
  0x79   : > { %2854 = vmatmul.mubr.msk.f32.gmra.mrb[12].mxu0 %vm359_vm0, %v354_v16 }
  0x7a   : > { %2856 = vmatprep.mubr.msk.f32.mxu0 %vm359_vm0, %v355_v17 }
  0x7d   : > { %2857 = vmatmul.mubr.msk.f32.gmra.mrb[14].mxu0 %vm359_vm0, %v356_v18 }
 0x134   : > { %v2837_v22 = vpop.f32.mrb[0].mxu0 }
 0x135   : > { %v474_v23 = vpop.f32.mrb[1].mxu0 }
 0x136   : > { %v2976_v24 = vpack.c.bf16 %v2837_v22, %v474_v23  ;;  %2861 = vmatprep.mubr.msk.f32.mxu1 %vm554_vm1, %v474_v23 }
 0x137   : > { %2862 = vmatmul.mubr.msk.f32.vlgmr.msra.gmra.mrb[0].mxu1 %vm554_vm1, %v2837_v22 }
 0x138   : > { %v2840_v25 = vpop.f32.mrb[2].mxu0  ;;  %2977 = vmatprep.subr.bf16.mxu0 %v2976_v24  ;;  %2886 = vmatpush3.msra.mxu1 %v748_v20 }
 0x139   : > { %v484_v26 = vpop.f32.mrb[3].mxu0  ;;  %2979 = vmatpush3.bf16.msra.mxu0 %v2976_v24 }
 0x13a   : > { %v3565_v27 = vpack.c.bf16 %v2840_v25, %v484_v26  ;;  %2864 = vmatprep.mubr.msk.f32.mxu1 %vm554_vm1, %v484_v26 }
 0x13b   : > { %2865 = vmatmul.mubr.msk.f32.gmra.mrb[2].mxu1 %vm554_vm1, %v2840_v25 }
 0x13c   : > { %v2843_v28 = vpop.f32.mrb[4].mxu0  ;;  %2981 = vmatprep.subr.bf16.mxu0 %v3565_v27 }
 0x13d   : > { %v494_v29 = vpop.f32.mrb[5].mxu0 }
 0x13e   : > { %v3570_v30 = vpack.c.bf16 %v2843_v28, %v494_v29  ;;  %2867 = vmatprep.mubr.msk.f32.mxu1 %vm554_vm1, %v494_v29 }
 0x13f   : > { %2868 = vmatmul.mubr.msk.f32.gmra.mrb[4].mxu1 %vm554_vm1, %v2843_v28 }
 0x140   : > { %v2846_v31 = vpop.f32.mrb[6].mxu0 }
 0x141   : > { %v504_v32 = vpop.f32.mrb[7].mxu0 }
 0x142   : > { %v3574_v33 = vpack.c.bf16 %v2846_v31, %v504_v32  ;;  %2870 = vmatprep.mubr.msk.f32.mxu1 %vm554_vm1, %v504_v32 }
 0x143   : > { %2871 = vmatmul.mubr.msk.f32.gmra.mrb[6].mxu1 %vm554_vm1, %v2846_v31 }
 0x144   : > { %v2849_v34 = vpop.f32.mrb[8].mxu0 }
 0x145   : > { %v514_v35 = vpop.f32.mrb[9].mxu0 }
 0x146   : > { %v3578_v36 = vpack.c.bf16 %v2849_v34, %v514_v35  ;;  %2873 = vmatprep.mubr.msk.f32.mxu1 %vm554_vm1, %v514_v35 }
 0x147   : > { %2874 = vmatmul.mubr.msk.f32.gmra.mrb[8].mxu1 %vm554_vm1, %v2849_v34 }
 0x148   : > { %v2852_v37 = vpop.f32.mrb[10].mxu0 }
 0x149   : > { %v524_v38 = vpop.f32.mrb[11].mxu0 }
 0x14a   : > { %v3582_v39 = vpack.c.bf16 %v2852_v37, %v524_v38  ;;  %2876 = vmatprep.mubr.msk.f32.mxu1 %vm554_vm1, %v524_v38 }
 0x14b   : > { %2877 = vmatmul.mubr.msk.f32.gmra.mrb[10].mxu1 %vm554_vm1, %v2852_v37 }
 0x14c   : > { %v2855_v40 = vpop.f32.mrb[12].mxu0 }
 0x14d   : > { %v534_v41 = vpop.f32.mrb[13].mxu0 }
 0x14e   : > { %v3586_v42 = vpack.c.bf16 %v2855_v40, %v534_v41  ;;  %2879 = vmatprep.mubr.msk.f32.mxu1 %vm554_vm1, %v534_v41 }
 0x14f   : > { %2880 = vmatmul.mubr.msk.f32.gmra.mrb[12].mxu1 %vm554_vm1, %v2855_v40 }
 0x150   : > { %v2858_v43 = vpop.f32.mrb[14].mxu0 }
 0x151   : > { %v544_v44 = vpop.f32.mrb[15].mxu0 }
 0x152   : > { %v3590_v45 = vpack.c.bf16 %v2858_v43, %v544_v44  ;;  %2882 = vmatprep.mubr.msk.f32.mxu1 %vm554_vm1, %v544_v44 }
 0x153   : > { %2883 = vmatmul.mubr.msk.f32.gmra.mrb[14].mxu1 %vm554_vm1, %v2858_v43 }
 0x154   : > { %2887 = vmatprep.mubr.msk.f32.mxu1 %vm554_vm1, %v474_v23  ;;  %v1230_v23 = vlaneseq }
 0x157   : > { %2888 = vmatmul.mubr.msk.f32.vlgmr.msra.gmra.mrb[16].mxu1 %vm554_vm1, %v2837_v22 }
 0x158   : > { %2890 = vmatprep.mubr.msk.f32.mxu1 %vm554_vm1, %v484_v26  ;;  %v2714_v26 = vld [vmem:[%s3513_s23] sm:$0xff]  }
 0x15b   : > { %2891 = vmatmul.mubr.msk.f32.gmra.mrb[18].mxu1 %vm554_vm1, %v2840_v25  ;;  %v1231_v25 = vshrl.u32 %v1230_v23, 7 }
 0x15c   : > { %2893 = vmatprep.mubr.msk.f32.mxu1 %vm554_vm1, %v494_v29 }
 0x15f   : > { %2894 = vmatmul.mubr.msk.f32.gmra.mrb[20].mxu1 %vm554_vm1, %v2843_v28 }
 0x160   : > { %2896 = vmatprep.mubr.msk.f32.mxu1 %vm554_vm1, %v504_v32  ;;  %v2716_v32 = vunpack.c.1.s8 %v2714_v26 }
 0x163   : > { %2897 = vmatmul.mubr.msk.f32.gmra.mrb[22].mxu1 %vm554_vm1, %v2846_v31  ;;  %v2715_v31 = vunpack.c.0.s8 %v2714_v26 }
 0x164   : > { %2899 = vmatprep.mubr.msk.f32.mxu1 %vm554_vm1, %v514_v35 }
 0x167   : > { %2900 = vmatmul.mubr.msk.f32.gmra.mrb[24].mxu1 %vm554_vm1, %v2849_v34  ;;  %v3627_v34 = vsub.s32 0, %v1231_v25 }
 0x168   : > { %2902 = vmatprep.mubr.msk.f32.mxu1 %vm554_vm1, %v524_v38  ;;  %v1358_v38 = vcvt.s32.f32 %v2715_v31 }
 0x16a   : > { %vm1374_vm2 = vcmp.gt.f32.partialorder %v1358_v38, 0.0 }
 0x16b   : > { %2903 = vmatmul.mubr.msk.f32.gmra.mrb[26].mxu1 %vm554_vm1, %v2852_v37 }
 0x16c   : > { %2905 = vmatprep.mubr.msk.f32.mxu1 %vm554_vm1, %v534_v41 }
 0x16f   : > { %2906 = vmatmul.mubr.msk.f32.gmra.mrb[28].mxu1 %vm554_vm1, %v2855_v40  ;;  %v1359_v40 = vcvt.s32.f32 %v2716_v32 }
 0x170   : > { %2908 = vmatprep.mubr.msk.f32.mxu1 %vm554_vm1, %v544_v44 }
 0x171   : > { %vm1375_vm3 = vcmp.gt.f32.partialorder %v1359_v40, 0.0 }
 0x173   : > { %2909 = vmatmul.mubr.msk.f32.gmra.mrb[30].mxu1 %vm554_vm1, %v2858_v43 }
 0x20a   : > { %v2863_v46 = vpop.f32.mrb[0].mxu1 }
 0x20b   : > { %1157 = vperm.xlu0 %3073, %v2863_v46   ;;  %v669_v47 = vpop.f32.mrb[1].mxu1 }
 0x20e   : > { %v2866_v48 = vpop.f32.mrb[2].mxu1 }
 0x20f   : > { %1152 = vperm.xlu0 %3073, %v669_v47   ;;  %1167 = vperm.xlu1 %3074, %v2866_v48   ;;  %v679_v49 = vpop.f32.mrb[3].mxu1 }
 0x212   : > { %v2869_v50 = vpop.f32.mrb[4].mxu1 }
 0x213   : > { %1162 = vperm.xlu1 %3074, %v679_v49   ;;  %v689_v51 = vpop.f32.mrb[5].mxu1 }
 0x214   : > { %1172 = vperm.xlu0 %3073, %v689_v51  }
 0x216   : > { %v2872_v52 = vpop.f32.mrb[6].mxu1 }
 0x217   : > { %1177 = vperm.xlu1 %3074, %v2869_v50   ;;  %v699_v53 = vpop.f32.mrb[7].mxu1 }
 0x218   : > { %1182 = vperm.xlu0 %3073, %v699_v53  }
 0x21a   : > { %v2875_v54 = vpop.f32.mrb[8].mxu1 }
 0x21b   : > { %1187 = vperm.xlu1 %3074, %v2872_v52   ;;  %v709_v55 = vpop.f32.mrb[9].mxu1 }
 0x21c   : > { %1192 = vperm.xlu0 %3073, %v709_v55   ;;  %v3009_v55 = vld [vmem:[%s3513_s23 + $0x8] sm:$0xff]  }
 0x21e   : > { %v2878_v56 = vpop.f32.mrb[10].mxu1 }
 0x21f   : > { %1197 = vperm.xlu1 %3074, %v2875_v54   ;;  %v719_v57 = vpop.f32.mrb[11].mxu1 }
 0x220   : > { %1202 = vperm.xlu0 %3073, %v719_v57  }
 0x222   : > { %v2881_v58 = vpop.f32.mrb[12].mxu1 }
 0x223   : > { %1207 = vperm.xlu1 %3074, %v2878_v56   ;;  %v729_v59 = vpop.f32.mrb[13].mxu1 }
 0x224   : > { %1212 = vperm.xlu0 %3073, %v729_v59   ;;  %v2723_v59 = vunpack.c.0.s8 %v3009_v55 }
 0x226   : > { %v2884_v60 = vpop.f32.mrb[14].mxu1 }
 0x227   : > { %1217 = vperm.xlu1 %3074, %v2881_v58   ;;  %v739_v61 = vpop.f32.mrb[15].mxu1  ;;  %v2724_v58 = vunpack.c.1.s8 %v3009_v55 }
 0x22a   : > { %v2889_v62 = vpop.f32.mrb[16].mxu1 }
 0x22b   : > { %1227 = vperm.xlu1 %3074, %v2884_v60   ;;  %v815_v63 = vpop.f32.mrb[17].mxu1 }
 0x22e   : > { %v2892_v0 = vpop.f32.mrb[18].mxu1 }
 0x22f   : > { %1222 = vperm.xlu1 %3074, %v739_v61   ;;  %v825_v1 = vpop.f32.mrb[19].mxu1  ;;  %v3011_v61 = vld [vmem:[%s3513_s23 + $0x10] sm:$0xff]  }
 0x232   : > { %v2895_v2 = vpop.f32.mrb[20].mxu1 }
 0x233   : > { %v835_v3 = vpop.f32.mrb[21].mxu1 }
 0x236   : > { %v2898_v4 = vpop.f32.mrb[22].mxu1 }
 0x237   : > { %v845_v5 = vpop.f32.mrb[23].mxu1 }
 0x23a   : > { %v2901_v6 = vpop.f32.mrb[24].mxu1 }
 0x23b   : > { %v855_v7 = vpop.f32.mrb[25].mxu1 }
 0x23e   : > { %v2904_v8 = vpop.f32.mrb[26].mxu1 }
 0x23f   : > { %v865_v9 = vpop.f32.mrb[27].mxu1 }
 0x242   : > { %894 = vxpose.xlu0.b32.start [1/2] (short) (narrow) %v815_v63, 8  ;;  %v2907_v10 = vpop.f32.mrb[28].mxu1  ;;  %v3649_v63 = vcvt.s32.f32 %v2723_v59 }
 0x243   : > { %v875_v11 = vpop.f32.mrb[29].mxu1 }
 0x244   : > { %vm1378_vm7 = vcmp.gt.f32.partialorder %v3649_v63, 0.0 }
 0x246   : > { %895 = vxpose.xlu0.b32.end [2/2] (short) (narrow) %v2889_v62, 8  ;;  %v2910_v12 = vpop.f32.mrb[30].mxu1  ;;  %v3647_v62 = vcvt.s32.f32 %v2724_v58 }
 0x247   : > { %v885_v13 = vpop.f32.mrb[31].mxu1 }
 0x248   : > { %vm1379_vm6 = vcmp.gt.f32.partialorder %v3647_v62, 0.0 }
 0x24a   : > { %958 = vxpose.xlu0.b32.start [1/2] (short) (narrow) %v835_v3, 8  ;;  %v2720_v3 = vunpack.c.3.s8 %v2714_v26 }
 0x24e   : > { %959 = vxpose.xlu0.b32.end [2/2] (short) (narrow) %v2895_v2, 8 }
 0x252   : > { %990 = vxpose.xlu0.b32.start [1/2] (short) (narrow) %v845_v5, 8  ;;  %v2727_v5 = vunpack.c.2.s8 %v3009_v55 }
 0x256   : > { %991 = vxpose.xlu0.b32.end [2/2] (short) (narrow) %v2898_v4, 8  ;;  %v2719_v4 = vunpack.c.2.s8 %v2714_v26 }
 0x258   : > { %926 = vxpose.xlu1.b32.start [1/2] (short) (narrow) %v825_v1, 8 }
 0x25a   : > { %1022 = vxpose.xlu0.b32.start [1/2] (short) (narrow) %v855_v7, 8 }
 0x25c   : > { %927 = vxpose.xlu1.b32.end [2/2] (short) (narrow) %v2892_v0, 8  ;;  %v2728_v0 = vunpack.c.3.s8 %v3009_v55 }
 0x25e   : > { %1023 = vxpose.xlu0.b32.end [2/2] (short) (narrow) %v2901_v6, 8  ;;  %v2732_v6 = vunpack.c.1.s8 %v3011_v61 }
 0x260   : > { %1054 = vxpose.xlu1.b32.start [1/2] (short) (narrow) %v865_v9, 8  ;;  %v3661_v25 = vcvt.s32.f32 %v2732_v6 }
 0x262   : > { %1086 = vxpose.xlu0.b32.start [1/2] (short) (narrow) %v875_v11, 8 }
 0x264   : > { %1055 = vxpose.xlu1.b32.end [2/2] (short) (narrow) %v2904_v8, 8 }
 0x266   : > { %1087 = vxpose.xlu0.b32.end [2/2] (short) (narrow) %v2907_v10, 8  ;;  %v3656_v10 = vcvt.s32.f32 %v2728_v0 }
 0x268   : > { %1118 = vxpose.xlu1.b32.start [1/2] (short) (narrow) %v885_v13, 8  ;;  %v1360_v13 = vcvt.s32.f32 %v2719_v4  ;;  %vm1381_vm10 = vcmp.gt.f32.partialorder %v3656_v10, 0.0 }
 0x26a   : > { %vm1376_vm12 = vcmp.gt.f32.partialorder %v1360_v13, 0.0 }
 0x26c   : > { %1119 = vxpose.xlu1.b32.end [2/2] (short) (narrow) %v2910_v12, 8  ;;  %v1361_v12 = vcvt.s32.f32 %v2720_v3 }
 0x26e   : > { %vm1377_vm11 = vcmp.gt.f32.partialorder %v1361_v12, 0.0 }
 0x28a   : > { %v1158_v14 = vpop.permute.xlu0 %1157 }
 0x28e   : > { %v1153_v15 = vpop.permute.xlu0 %1152  ;;  %v3610_v16 = vpop.permute.xlu1 %1167 }
 0x292   : > { %v3612_v18 = vpop.permute.xlu1 %1162 }
 0x293   : > { %v1173_v17 = vpop.permute.xlu0 %1172 }
 0x296   : > { %v1178_v20 = vpop.permute.xlu1 %1177 }
 0x297   : > { %v3614_v19 = vpop.permute.xlu0 %1182 }
 0x29a   : > { %v3618_v22 = vpop.permute.xlu1 %1187 }
 0x29b   : > { %v3616_v21 = vpop.permute.xlu0 %1192 }
 0x29e   : > { %v3623_v28 = vpop.permute.xlu1 %1197 }
 0x29f   : > { %v3620_v24 = vpop.permute.xlu0 %1202 }
 0x2a2   : > { %v3629_v35 = vpop.permute.xlu1 %1207 }
 0x2a3   : > { %v3625_v29 = vpop.permute.xlu0 %1212 }
 0x2a6   : > { %v3632_v48 = vpop.permute.xlu1 %1217 }
 0x2aa   : > { %v3643_v56 = vpop.permute.xlu1 %1227 }
 0x2ae   : > { %v3651_v1 = vpop.permute.xlu1 %1222 }
 0x2c2   : > { %v910_v37 = vpop.trf.xlu0 }
 0x2c3   : > { %v1233_v41 = vrot.slane %v910_v37, %v3627_v34 }
 0x2c5   : > { %v1262_v43 = vadd.f32 %v1233_v41, %v1153_v15  ;;  %v1263_v44 = vadd.f32 %v1233_v41, %v1158_v14  ;;  %v3658_v14 = vcvt.s32.f32 %v2727_v5  ;;  %v2731_v15 = vunpack.c.0.s8 %v3011_v61 }
 0x2c7   : > { %vm1278_vm4 = vcmp.gt.f32.partialorder %v1262_v43, 0.0  ;;  %v1294_v46 = vmul.f32 0.2, %v1262_v43  ;;  %vm1279_vm5 = vcmp.gt.f32.partialorder %v1263_v44, 0.0  ;;  %v1295_v47 = vmul.f32 0.2, %v1263_v44 }
 0x2c8   : > { %vm1380_vm13 = vcmp.gt.f32.partialorder %v3658_v14, 0.0 }
 0x2c9   : > { %v1310_v49 = vsel %vm1278_vm4, %v1262_v43, %v1294_v46  ;;  %v1311_v50 = vsel %vm1279_vm5, %v1263_v44, %v1295_v47  ;;  %v3670_v44 = vcvt.s32.f32 %v2731_v15 }
 0x2ca   : > { %v3634_v51 = vsel %vm1374_vm2, %v1310_v49, -9e+15  ;;  %v3636_v52 = vsel %vm1375_vm3, %v1311_v50, -9e+15  ;;  %v974_v57 = vpop.trf.xlu0  ;;  %vm1383_vm3 = vcmp.gt.f32.partialorder %v3661_v25, 0.0 }
 0x2cb   : > { %v1406_v53 = vsel %vm359_vm0, %v3634_v51, -inf  ;;  %v1409_v54 = vsel %vm359_vm0, %v3636_v52, -inf  ;;  %v1241_v60 = vrot.slane %v974_v57, %v3627_v34  ;;  %vm1382_vm4 = vcmp.gt.f32.partialorder %v3670_v44, 0.0 }
 0x2cc   : > { %1407 = vmax.xlane.f32.xlu0 %v1406_v53  ;;  %1410 = vmax.xlane.f32.xlu1 %v1409_v54  ;;  %v3681_v54 = vld [vmem:[%s3513_s23 + $0x18] sm:$0xff]   ;;  %s338_s23 = scalar_lea.vmem [#allocation7], %s2622_s17 }
 0x2cd   : > { %v1266_v7 = vadd.f32 %v1241_v60, %v1173_v17  ;;  %v1267_v8 = vadd.f32 %v1241_v60, %v1178_v20  ;;  %v2736_v17 = vunpack.c.3.s8 %v3011_v61  ;;  %v2735_v20 = vunpack.c.2.s8 %v3011_v61  ;;  %s2515_s18 = sshll.u32 %s338_s23, 4  ;;  %s4000_s18 = int_to_ptr.vmem [resolvable:$true] %s2515_s18 }
 0x2ce   : > { %v2740_v5 = vunpack.c.1.s8 %v3681_v54  ;;  %v2739_v13 = vunpack.c.0.s8 %v3681_v54  ;;  %s3231_s16 = scalar_lea.vmem %s4000_s18, 128  ;;  %p3238_p5 = scmp.lt.s32.totalorder %s4000_s18, %s3236_s29 }
 0x2cf   : > { %vm1283_vm8 = vcmp.gt.f32.partialorder %v1267_v8, 0.0  ;;  %v1299_v31 = vmul.f32 0.2, %v1267_v8  ;;  %vm1282_vm9 = vcmp.gt.f32.partialorder %v1266_v7, 0.0  ;;  %v1298_v32 = vmul.f32 0.2, %v1266_v7  ;;  %p3232_p13 = scmp.ne.s32.totalorder %s4000_s18, %s3231_s16  ;;  %p3239_p7 = scmp.lt.s32.totalorder %s3237_s22, %s3231_s16 }
 0x2d1   : > { %v1315_v47 = vsel %vm1283_vm8, %v1267_v8, %v1299_v31  ;;  %v1314_v49 = vsel %vm1282_vm9, %v1266_v7, %v1298_v32  ;;  %p3233_p11 = pnand %p3232_p13, %p4062_p1  ;;  %p3240_p9 = por %p3239_p7, %p3238_p5 }
 0x2d2   : > { %v1006_v2 = vpop.trf.xlu0  ;;  %v3698_v3 = vsel %vm1379_vm6, %v1315_v47, -9e+15  ;;  %v3702_v4 = vsel %vm1378_vm7, %v1314_v49, -9e+15 }
 0x2d3   : > { %v1245_v9 = vrot.slane %v1006_v2, %v3627_v34  ;;  %v1421_v63 = vsel %vm359_vm0, %v3698_v3, -inf  ;;  %p3234_p10 = pneg %p3233_p11 }
 0x2d5   : > { %v1269_v37 = vadd.f32 %v1245_v9, %v3618_v22  ;;  %v1268_v43 = vadd.f32 %v1245_v9, %v3614_v19  ;;  %v3672_v22 = vcvt.s32.f32 %v2736_v17  ;;  %p3241_p3 = pnand %p3240_p9, %p3234_p10 }
 0x2d7   : > { %vm1285_vm2 = vcmp.gt.f32.partialorder %v1269_v37, 0.0  ;;  %v1301_v53 = vmul.f32 0.2, %v1269_v37  ;;  %v1300_v60 = vmul.f32 0.2, %v1268_v43  ;;  %vm1284_vm5 = vcmp.gt.f32.partialorder %v1268_v43, 0.0 }
 0x2d8   : > { %v942_v11 = vpop.trf.xlu1  ;;  %vm1385_vm7 = vcmp.gt.f32.partialorder %v3672_v22, 0.0 }
 0x2d9   : > { %v1237_v23 = vrot.slane %v942_v11, %v3627_v34  ;;  %v1317_v8 = vsel %vm1285_vm2, %v1269_v37, %v1301_v53  ;;  %v1316_v12 = vsel %vm1284_vm5, %v1268_v43, %v1300_v60  ;;  %v2743_v43 = vunpack.c.2.s8 %v3681_v54 }
 0x2da   : > { %v1038_v26 = vpop.trf.xlu0  ;;  %v3717_v15 = vsel %vm1381_vm10, %v1317_v8, -9e+15  ;;  %v3723_v17 = vsel %vm1380_vm13, %v1316_v12, -9e+15 }
 0x2db   : > { %v1264_v38 = vadd.f32 %v1237_v23, %v3612_v18  ;;  %v1265_v40 = vadd.f32 %v1237_v23, %v3610_v16  ;;  %v1249_v41 = vrot.slane %v1038_v26, %v3627_v34  ;;  %v3674_v18 = vcvt.s32.f32 %v2735_v20 }
 0x2dc   : > { %v1424_v14 = vsel %vm359_vm0, %v3723_v17, -inf  ;;  %v1372_v60 = vcvt.s32.f32 %v2743_v43 }
 0x2dd   : > { %vm1281_vm14 = vcmp.gt.f32.partialorder %v1265_v40, 0.0  ;;  %v1297_v46 = vmul.f32 0.2, %v1265_v40  ;;  %vm1280_vm15 = vcmp.gt.f32.partialorder %v1264_v38, 0.0  ;;  %v1296_v16 = vmul.f32 0.2, %v1264_v38 }
 0x2de   : > { %v1271_v19 = vadd.f32 %v1249_v41, %v3623_v28  ;;  %v1270_v55 = vadd.f32 %v1249_v41, %v3616_v21  ;;  %vm1384_vm9 = vcmp.gt.f32.partialorder %v3674_v18, 0.0  ;;  %vm1388_vm5 = vcmp.gt.f32.partialorder %v1372_v60, 0.0 }
 0x2df   : > { %v1313_v50 = vsel %vm1281_vm14, %v1265_v40, %v1297_v46  ;;  %v1312_v59 = vsel %vm1280_vm15, %v1264_v38, %v1296_v16  ;;  %v1427_v40 = vsel %vm359_vm0, %v3717_v15, -inf }
 0x2e0   : > { %v1070_v57 = vpop.trf.xlu1  ;;  %v3685_v58 = vsel %vm1377_vm11, %v1313_v50, -9e+15  ;;  %v3692_v0 = vsel %vm1376_vm12, %v1312_v59, -9e+15  ;;  %v1303_v9 = vmul.f32 0.2, %v1271_v19 }
 0x2e1   : > { %v1253_v61 = vrot.slane %v1070_v57, %v3627_v34  ;;  %v1415_v28 = vsel %vm359_vm0, %v3685_v58, -inf  ;;  %v1412_v21 = vsel %vm359_vm0, %v3692_v0, -inf  ;;  %vm1287_vm8 = vcmp.gt.f32.partialorder %v1271_v19, 0.0 }
 0x2e2   : > { %1416 = vmax.xlane.f32.xlu0 %v1415_v28  ;;  %v1102_v2 = vpop.trf.xlu0  ;;  %1413 = vmax.xlane.f32.xlu1 %v1412_v21  ;;  %v1302_v62 = vmul.f32 0.2, %v1270_v55  ;;  %vm1286_vm6 = vcmp.gt.f32.partialorder %v1270_v55, 0.0  ;;  %v1319_v20 = vsel %vm1287_vm8, %v1271_v19, %v1303_v9  ;;  %vm3311_vm8 = vmmov 0  }
 0x2e3   : > { %v1273_v6 = vadd.f32 %v1253_v61, %v3629_v35  ;;  %v1257_v7 = vrot.slane %v1102_v2, %v3627_v34  ;;  %v1272_v11 = vadd.f32 %v1253_v61, %v3620_v24  ;;  %v1418_v35 = vsel %vm359_vm0, %v3702_v4, -inf }
 0x2e4   : > { %v1371_v24 = vcvt.s32.f32 %v2740_v5  ;;  %v1318_v37 = vsel %vm1286_vm6, %v1270_v55, %v1302_v62  ;;  %v3733_v41 = vsel %vm1383_vm3, %v1319_v20, -9e+15 }
 0x2e5   : > { %v1275_v23 = vadd.f32 %v1257_v7, %v3632_v48  ;;  %v1305_v26 = vmul.f32 0.2, %v1273_v6  ;;  %v1274_v31 = vadd.f32 %v1257_v7, %v3625_v29  ;;  %vm1289_vm11 = vcmp.gt.f32.partialorder %v1273_v6, 0.0 }
 0x2e6   : > { %1422 = vmax.xlane.f32.xlu0 %v1421_v63  ;;  %1419 = vmax.xlane.f32.xlu1 %v1418_v35  ;;  %v1304_v10 = vmul.f32 0.2, %v1272_v11  ;;  %vm1288_vm10 = vcmp.gt.f32.partialorder %v1272_v11, 0.0  ;;  %v1370_v48 = vcvt.s32.f32 %v2739_v13  ;;  %v2744_v29 = vunpack.c.3.s8 %v3681_v54 }
 0x2e7   : > { %v1321_v16 = vsel %vm1289_vm11, %v1273_v6, %v1305_v26  ;;  %v1307_v47 = vmul.f32 0.2, %v1275_v23  ;;  %vm1291_vm12 = vcmp.gt.f32.partialorder %v1275_v23, 0.0  ;;  %v1306_v25 = vmul.f32 0.2, %v1274_v31 }
 0x2e8   : > { %v1134_v32 = vpop.trf.xlu1  ;;  %v1320_v19 = vsel %vm1288_vm10, %v1272_v11, %v1304_v10  ;;  %v1433_v50 = vsel %vm359_vm0, %v3733_v41, -inf  ;;  %vm1290_vm13 = vcmp.gt.f32.partialorder %v1274_v31, 0.0  ;;  %v3749_v44 = vsel %vm1385_vm7, %v1321_v16, -9e+15 }
 0x2e9   : > { %v1261_v38 = vrot.slane %v1134_v32, %v3627_v34  ;;  %v3740_v34 = vsel %vm1382_vm4, %v1318_v37, -9e+15  ;;  %vm1387_vm14 = vcmp.gt.f32.partialorder %v1371_v24, 0.0  ;;  %vm1386_vm15 = vcmp.gt.f32.partialorder %v1370_v48, 0.0 }
 0x2ea   : > { %1428 = vmax.xlane.f32.xlu0 %v1427_v40  ;;  %1425 = vmax.xlane.f32.xlu1 %v1424_v14  ;;  %v1323_v53 = vsel %vm1291_vm12, %v1275_v23, %v1307_v47  ;;  %v1373_v55 = vcvt.s32.f32 %v2744_v29  ;;  %v1322_v57 = vsel %vm1290_vm13, %v1274_v31, %v1306_v25  ;;  %v1439_v61 = vsel %vm359_vm0, %v3749_v44, -inf }
 0x2eb   : > { %v1277_v46 = vadd.f32 %v1261_v38, %v3643_v56  ;;  %v1276_v49 = vadd.f32 %v1261_v38, %v3651_v1  ;;  %v1430_v56 = vsel %vm359_vm0, %v3740_v34, -inf  ;;  %v3753_v1 = vsel %vm1384_vm9, %v1320_v19, -9e+15 }
 0x2ec   : > { %v1436_v22 = vsel %vm359_vm0, %v3753_v1, -inf  ;;  %v3759_v28 = vsel %vm1387_vm14, %v1323_v53, -9e+15  ;;  %v3762_v18 = vsel %vm1386_vm15, %v1322_v57, -9e+15  ;;  %vm1389_vm4 = vcmp.gt.f32.partialorder %v1373_v55, 0.0 }
 0x2ed   : > { %v1309_v54 = vmul.f32 0.2, %v1277_v46  ;;  %vm1293_vm2 = vcmp.gt.f32.partialorder %v1277_v46, 0.0  ;;  %v1308_v59 = vmul.f32 0.2, %v1276_v49  ;;  %vm1292_vm3 = vcmp.gt.f32.partialorder %v1276_v49, 0.0 }
 0x2ee   : > { %1434 = vmax.xlane.f32.xlu0 %v1433_v50  ;;  %1431 = vmax.xlane.f32.xlu1 %v1430_v56  ;;  %v1445_v5 = vsel %vm359_vm0, %v3759_v28, -inf  ;;  %v1442_v6 = vsel %vm359_vm0, %v3762_v18, -inf  ;;  %vm2414_vm14 = vcmask 1041409  }
 0x2ef   : > { %v1325_v2 = vsel %vm1293_vm2, %v1277_v46, %v1309_v54  ;;  %v1324_v21 = vsel %vm1292_vm3, %v1276_v49, %v1308_v59 }
 0x2f0   : > { %v3768_v7 = vsel %vm1389_vm4, %v1325_v2, -9e+15  ;;  %v3770_v8 = vsel %vm1388_vm5, %v1324_v21, -9e+15  ;;  %vm2416_vm5 = vcmask 1042434  }
 0x2f1   : > { %v1451_v9 = vsel %vm359_vm0, %v3768_v7, -inf  ;;  %v1448_v11 = vsel %vm359_vm0, %v3770_v8, -inf }
 0x2f2   : > { %1440 = vmax.xlane.f32.xlu0 %v1439_v61  ;;  %1437 = vmax.xlane.f32.xlu1 %v1436_v22 }
 0x2f6   : > { %1446 = vmax.xlane.f32.xlu0 %v1445_v5  ;;  %1443 = vmax.xlane.f32.xlu1 %v1442_v6 }
 0x2fa   : > { %1452 = vmax.xlane.f32.xlu0 %v1451_v9  ;;  %1449 = vmax.xlane.f32.xlu1 %v1448_v11 }
 0x359   : > { %v1408_v12 = vpop.xlane.xlu0 %1407  ;;  %v1411_v62 = vpop.xlane.xlu1 %1410 }
 0x35a   : > { %v1454_v63 = vsub.f32 %v3634_v51, %v1408_v12  ;;  %v1455_v13 = vsub.f32 %v3636_v52, %v1411_v62 }
 0x35c   : > { %v1470_v35 = vmul.f32 1.442695, %v1454_v63  ;;  %v1472_v24 = vmul.f32 1.442695, %v1455_v13 }
 0x35e   : > { %3075 = vpow2.f32 %v1470_v35 }
 0x35f   : > { %3077 = vpow2.f32 %v1472_v24 }
 0x368   : > { %v3778_v23 = vpop.eup %3075 }
 0x369   : > { %v3780_v20 = vpop.eup %3077  ;;  %v1502_v26 = vsel %vm359_vm0, %v3778_v23, 0.0 }
 0x36a   : > { %1503 = vadd.xlane.f32.xlu1 %v1502_v26  ;;  %v1505_v31 = vsel %vm359_vm0, %v3780_v20, 0.0 }
 0x36b   : > { %1506 = vadd.xlane.f32.xlu0 %v1505_v31 }
 0x36f   : > { %v1417_v32 = vpop.xlane.xlu0 %1416  ;;  %v1414_v52 = vpop.xlane.xlu1 %1413 }
 0x370   : > { %v1457_v51 = vsub.f32 %v3685_v58, %v1417_v32  ;;  %v1456_v37 = vsub.f32 %v3692_v0, %v1414_v52 }
 0x372   : > { %v1476_v10 = vmul.f32 1.442695, %v1457_v51  ;;  %v1474_v38 = vmul.f32 1.442695, %v1456_v37 }
 0x373   : > { %v1423_v40 = vpop.xlane.xlu0 %1422  ;;  %v1420_v14 = vpop.xlane.xlu1 %1419 }
 0x374   : > { %3079 = vpow2.f32 %v1476_v10  ;;  %v1459_v48 = vsub.f32 %v3698_v3, %v1423_v40  ;;  %v1458_v29 = vsub.f32 %v3702_v4, %v1420_v14 }
 0x375   : > { %3081 = vpow2.f32 %v1474_v38 }
 0x376   : > { %v1480_v43 = vmul.f32 1.442695, %v1459_v48  ;;  %v1478_v46 = vmul.f32 1.442695, %v1458_v29 }
 0x377   : > { %v1429_v16 = vpop.xlane.xlu0 %1428  ;;  %v1426_v58 = vpop.xlane.xlu1 %1425 }
 0x378   : > { %3083 = vpow2.f32 %v1480_v43  ;;  %v1461_v47 = vsub.f32 %v3717_v15, %v1429_v16  ;;  %v1460_v0 = vsub.f32 %v3723_v17, %v1426_v58 }
 0x379   : > { %3085 = vpow2.f32 %v1478_v46 }
 0x37a   : > { %v1484_v49 = vmul.f32 1.442695, %v1461_v47  ;;  %v1482_v19 = vmul.f32 1.442695, %v1460_v0 }
 0x37b   : > { %v1435_v25 = vpop.xlane.xlu0 %1434  ;;  %v1432_v50 = vpop.xlane.xlu1 %1431 }
 0x37c   : > { %3087 = vpow2.f32 %v1484_v49  ;;  %v1463_v3 = vsub.f32 %v3733_v41, %v1435_v25  ;;  %v1462_v4 = vsub.f32 %v3740_v34, %v1432_v50 }
 0x37d   : > { %3089 = vpow2.f32 %v1482_v19 }
 0x37e   : > { %v3794_v56 = vpop.eup %3079  ;;  %v1488_v53 = vmul.f32 1.442695, %v1463_v3  ;;  %v1486_v15 = vmul.f32 1.442695, %v1462_v4 }
 0x37f   : > { %v3796_v54 = vpop.eup %3081  ;;  %v1441_v55 = vpop.xlane.xlu0 %1440  ;;  %v1511_v17 = vsel %vm359_vm0, %v3794_v56, 0.0 }
 0x380   : > { %3091 = vpow2.f32 %v1488_v53  ;;  %v1465_v57 = vsub.f32 %v3749_v44, %v1441_v55  ;;  %v1438_v59 = vpop.xlane.xlu1 %1437  ;;  %1512 = vadd.xlane.f32.xlu0 %v1511_v17  ;;  %v1508_v41 = vsel %vm359_vm0, %v3796_v54, 0.0 }
 0x381   : > { %3093 = vpow2.f32 %v1486_v15  ;;  %v1464_v34 = vsub.f32 %v3753_v1, %v1438_v59  ;;  %1509 = vadd.xlane.f32.xlu1 %v1508_v41 }
 0x382   : > { %v3804_v60 = vpop.eup %3083  ;;  %v1492_v61 = vmul.f32 1.442695, %v1465_v57 }
 0x383   : > { %v3806_v22 = vpop.eup %3085  ;;  %v1490_v2 = vmul.f32 1.442695, %v1464_v34  ;;  %v1447_v21 = vpop.xlane.xlu0 %1446  ;;  %v1517_v5 = vsel %vm359_vm0, %v3804_v60, 0.0 }
 0x384   : > { %3095 = vpow2.f32 %v1492_v61  ;;  %v1467_v44 = vsub.f32 %v3759_v28, %v1447_v21  ;;  %v1444_v6 = vpop.xlane.xlu1 %1443  ;;  %1518 = vadd.xlane.f32.xlu0 %v1517_v5  ;;  %v1514_v9 = vsel %vm359_vm0, %v3806_v22, 0.0 }
 0x385   : > { %3097 = vpow2.f32 %v1490_v2  ;;  %v1466_v1 = vsub.f32 %v3762_v18, %v1444_v6  ;;  %1515 = vadd.xlane.f32.xlu1 %v1514_v9 }
 0x386   : > { %v3814_v11 = vpop.eup %3087  ;;  %v1496_v12 = vmul.f32 1.442695, %v1467_v44 }
 0x387   : > { %v3816_v62 = vpop.eup %3089  ;;  %v1494_v63 = vmul.f32 1.442695, %v1466_v1  ;;  %v1453_v13 = vpop.xlane.xlu0 %1452  ;;  %v1523_v35 = vsel %vm359_vm0, %v3814_v11, 0.0 }
 0x388   : > { %3099 = vpow2.f32 %v1496_v12  ;;  %v1469_v28 = vsub.f32 %v3768_v7, %v1453_v13  ;;  %v1450_v24 = vpop.xlane.xlu1 %1449  ;;  %1524 = vadd.xlane.f32.xlu0 %v1523_v35  ;;  %v1520_v26 = vsel %vm359_vm0, %v3816_v62, 0.0 }
 0x389   : > { %3101 = vpow2.f32 %v1494_v63  ;;  %v1468_v18 = vsub.f32 %v3770_v8, %v1450_v24  ;;  %1521 = vadd.xlane.f32.xlu1 %v1520_v26 }
 0x38a   : > { %v3824_v31 = vpop.eup %3091  ;;  %v1500_v32 = vmul.f32 1.442695, %v1469_v28 }
 0x38b   : > { %v3826_v51 = vpop.eup %3093  ;;  %v1498_v52 = vmul.f32 1.442695, %v1468_v18  ;;  %v1529_v37 = vsel %vm359_vm0, %v3824_v31, 0.0 }
 0x38c   : > { %3103 = vpow2.f32 %v1500_v32  ;;  %1530 = vadd.xlane.f32.xlu0 %v1529_v37  ;;  %v1526_v7 = vsel %vm359_vm0, %v3826_v51, 0.0  ;;  %v3310_v37 = vmov 0.0  }
 0x38d   : > { %3105 = vpow2.f32 %v1498_v52  ;;  %1527 = vadd.xlane.f32.xlu1 %v1526_v7  ;;  %2967 = vmatprep.subr.mxu1 %v3310_v37 }
 0x38e   : > { %v3832_v10 = vpop.eup %3095  ;;  %2969 = vmatprep.mubr.msk.f32.mxu1 %vm3311_vm8, %v3310_v37  ;;  %vm2418_vm8 = vcmask 1043459  }
 0x38f   : > { %v3834_v8 = vpop.eup %3097  ;;  %v1535_v38 = vsel %vm359_vm0, %v3832_v10, 0.0 }
 0x390   : > { %1536 = vadd.xlane.f32.xlu0 %v1535_v38  ;;  %v1532_v40 = vsel %vm359_vm0, %v3834_v8, 0.0 }
 0x391   : > { %1533 = vadd.xlane.f32.xlu1 %v1532_v40 }
 0x392   : > { %v3840_v48 = vpop.eup %3099 }
 0x393   : > { %v3842_v14 = vpop.eup %3101  ;;  %v1541_v29 = vsel %vm359_vm0, %v3840_v48, 0.0 }
 0x394   : > { %1542 = vadd.xlane.f32.xlu0 %v1541_v29  ;;  %v1538_v43 = vsel %vm359_vm0, %v3842_v14, 0.0 }
 0x395   : > { %1539 = vadd.xlane.f32.xlu1 %v1538_v43 }
 0x396   : > { %v3848_v46 = vpop.eup %3103 }
 0x397   : > { %v3850_v16 = vpop.eup %3105  ;;  %v1547_v47 = vsel %vm359_vm0, %v3848_v46, 0.0 }
 0x398   : > { %1548 = vadd.xlane.f32.xlu0 %v1547_v47  ;;  %v1544_v58 = vsel %vm359_vm0, %v3850_v16, 0.0 }
 0x399   : > { %1545 = vadd.xlane.f32.xlu1 %v1544_v58 }
 0x3f7   : > { %v1504_v0 = vpop.xlane.xlu1 %1503 }
 0x3f8   : > { %v1507_v49 = vpop.xlane.xlu0 %1506  ;;  %3107 = vrcp.f32 %v1504_v0 }
 0x3f9   : > { %3109 = vrcp.f32 %v1507_v49 }
 0x402   : > { %v3108_v19 = vpop.eup %3107 }
 0x403   : > { %v3110_v25 = vpop.eup %3109  ;;  %v1566_v3 = vmul.f32 %v3108_v19, %v3778_v23 }
 0x404   : > { %v1567_v50 = vmul.f32 %v3110_v25, %v3780_v20 }
 0x405   : > { %2915 = vmatprep.mubr.msk.f32.mxu0 %vm359_vm0, %v1566_v3 }
 0x406   : > { %2916 = vmatmul.mubr.msk.f32.vlgmr.msra.gmra.mrb[16].mxu0 %vm359_vm0, %v1567_v50 }
 0x407   : > { %2983 = vmatpush3.bf16.msra.mxu0 %v3565_v27 }
 0x408   : > { %2985 = vmatprep.subr.bf16.mxu0 %v3570_v30 }
 0x40d   : > { %v1513_v4 = vpop.xlane.xlu0 %1512 }
 0x40e   : > { %3111 = vrcp.f32 %v1513_v4  ;;  %v1510_v53 = vpop.xlane.xlu1 %1509 }
 0x40f   : > { %3113 = vrcp.f32 %v1510_v53 }
 0x411   : > { %v1519_v15 = vpop.xlane.xlu0 %1518 }
 0x412   : > { %3115 = vrcp.f32 %v1519_v15  ;;  %v1516_v55 = vpop.xlane.xlu1 %1515 }
 0x413   : > { %3117 = vrcp.f32 %v1516_v55 }
 0x415   : > { %v1525_v17 = vpop.xlane.xlu0 %1524 }
 0x416   : > { %3119 = vrcp.f32 %v1525_v17  ;;  %v1522_v23 = vpop.xlane.xlu1 %1521 }
 0x417   : > { %3121 = vrcp.f32 %v1522_v23 }
 0x418   : > { %v3112_v20 = vpop.eup %3111 }
 0x419   : > { %v3114_v57 = vpop.eup %3113  ;;  %v1569_v59 = vmul.f32 %v3112_v20, %v3794_v56  ;;  %v1531_v41 = vpop.xlane.xlu0 %1530 }
 0x41a   : > { %3123 = vrcp.f32 %v1531_v41  ;;  %v1528_v27 = vpop.xlane.xlu1 %1527  ;;  %v1568_v34 = vmul.f32 %v3114_v57, %v3796_v54 }
 0x41b   : > { %3125 = vrcp.f32 %v1528_v27 }
 0x41c   : > { %v3116_v61 = vpop.eup %3115  ;;  %2922 = vmatprep.mubr.msk.f32.mxu0 %vm359_vm0, %v1568_v34 }
 0x41d   : > { %v3118_v2 = vpop.eup %3117  ;;  %v1571_v21 = vmul.f32 %v3116_v61, %v3804_v60  ;;  %2923 = vmatmul.mubr.msk.f32.vlgmr.msra.gmra.mrb[18].mxu0 %vm359_vm0, %v1569_v59  ;;  %v1537_v5 = vpop.xlane.xlu0 %1536 }
 0x41e   : > { %2987 = vmatpush3.bf16.msra.mxu0 %v3570_v30  ;;  %3127 = vrcp.f32 %v1537_v5  ;;  %v1534_v44 = vpop.xlane.xlu1 %1533  ;;  %v1570_v56 = vmul.f32 %v3118_v2, %v3806_v22 }
 0x41f   : > { %2989 = vmatprep.subr.bf16.mxu0 %v3574_v33  ;;  %3129 = vrcp.f32 %v1534_v44 }
 0x420   : > { %v3120_v54 = vpop.eup %3119  ;;  %2929 = vmatprep.mubr.msk.f32.mxu0 %vm359_vm0, %v1570_v56 }
 0x421   : > { %v3122_v6 = vpop.eup %3121  ;;  %v1573_v9 = vmul.f32 %v3120_v54, %v3814_v11  ;;  %2930 = vmatmul.mubr.msk.f32.vlgmr.msra.gmra.mrb[20].mxu0 %vm359_vm0, %v1571_v21  ;;  %v1543_v60 = vpop.xlane.xlu0 %1542 }
 0x422   : > { %2991 = vmatpush3.bf16.msra.mxu0 %v3574_v33  ;;  %3131 = vrcp.f32 %v1543_v60  ;;  %v1540_v30 = vpop.xlane.xlu1 %1539  ;;  %v1572_v1 = vmul.f32 %v3122_v6, %v3816_v62 }
 0x423   : > { %2993 = vmatprep.subr.bf16.mxu0 %v3578_v36  ;;  %3133 = vrcp.f32 %v1540_v30 }
 0x424   : > { %v3124_v22 = vpop.eup %3123  ;;  %2936 = vmatprep.mubr.msk.f32.mxu0 %vm359_vm0, %v1572_v1 }
 0x425   : > { %v3126_v12 = vpop.eup %3125  ;;  %v1575_v63 = vmul.f32 %v3124_v22, %v3824_v31  ;;  %2937 = vmatmul.mubr.msk.f32.vlgmr.msra.gmra.mrb[22].mxu0 %vm359_vm0, %v1573_v9  ;;  %v1549_v11 = vpop.xlane.xlu0 %1548 }
 0x426   : > { %2995 = vmatpush3.bf16.msra.mxu0 %v3578_v36  ;;  %3135 = vrcp.f32 %v1549_v11  ;;  %v1546_v33 = vpop.xlane.xlu1 %1545  ;;  %v1574_v13 = vmul.f32 %v3126_v12, %v3826_v51 }
 0x427   : > { %2997 = vmatprep.subr.bf16.mxu0 %v3582_v39  ;;  %3137 = vrcp.f32 %v1546_v33 }
 0x428   : > { %v3128_v62 = vpop.eup %3127  ;;  %2943 = vmatprep.mubr.msk.f32.mxu0 %vm359_vm0, %v1574_v13 }
 0x429   : > { %v3130_v35 = vpop.eup %3129  ;;  %v1577_v28 = vmul.f32 %v3128_v62, %v3832_v10  ;;  %2944 = vmatmul.mubr.msk.f32.vlgmr.msra.gmra.mrb[24].mxu0 %vm359_vm0, %v1575_v63 }
 0x42a   : > { %2999 = vmatpush3.bf16.msra.mxu0 %v3582_v39  ;;  %v1576_v24 = vmul.f32 %v3130_v35, %v3834_v8 }
 0x42b   : > { %3001 = vmatprep.subr.bf16.mxu0 %v3586_v42 }
 0x42c   : > { %v3132_v36 = vpop.eup %3131  ;;  %2950 = vmatprep.mubr.msk.f32.mxu0 %vm359_vm0, %v1576_v24 }
 0x42d   : > { %v3134_v26 = vpop.eup %3133  ;;  %v1579_v18 = vmul.f32 %v3132_v36, %v3840_v48  ;;  %2951 = vmatmul.mubr.msk.f32.vlgmr.msra.gmra.mrb[26].mxu0 %vm359_vm0, %v1577_v28 }
 0x42e   : > { %3003 = vmatpush3.bf16.msra.mxu0 %v3586_v42  ;;  %v1578_v31 = vmul.f32 %v3134_v26, %v3842_v14  ;;  %v2398_v42 = vld [vmem:[%s4047_s5] sm:$0xff] }
 0x42f   : > { %3005 = vmatprep.subr.bf16.mxu0 %v3590_v45  ;;  %2968 = vmatpush3.msra.mxu1 %v2398_v42 }
 0x430   : > { %v3136_v32 = vpop.eup %3135  ;;  %2957 = vmatprep.mubr.msk.f32.mxu0 %vm359_vm0, %v1578_v31 }
 0x431   : > { %v3138_v39 = vpop.eup %3137  ;;  %v1581_v51 = vmul.f32 %v3136_v32, %v3848_v46  ;;  %2958 = vmatmul.mubr.msk.f32.vlgmr.msra.gmra.mrb[28].mxu0 %vm359_vm0, %v1579_v18 }
 0x432   : > { %3007 = vmatpush3.bf16.msra.mxu0 %v3590_v45  ;;  %v1580_v52 = vmul.f32 %v3138_v39, %v3850_v16 }
 0x434   : > { %2964 = vmatprep.mubr.msk.f32.mxu0 %vm359_vm0, %v1580_v52 }
 0x435   : > { %2965 = vmatmul.mubr.msk.f32.vlgmr.msra.gmra.mrb[30].mxu0 %vm359_vm0, %v1581_v51 }
 0x4d9   : > { %v2917_v7 = vpop.f32.mrb[16].mxu0 }
 0x4da   : > { %v2247_v10 = vmin.f32 %v2917_v7, 0.0  ;;  %v1654_v8 = vpop.f32.mrb[17].mxu0  ;;  %vm2231_vm0 = vcmp.gt.f32.partialorder %v2917_v7, 0.0 }
 0x4db   : > { %v2246_v38 = vmin.f32 %v1654_v8, 0.0  ;;  %vm2230_vm6 = vcmp.gt.f32.partialorder %v1654_v8, 0.0 }
 0x4dc   : > { %v2264_v45 = vmul.f32 1.442695, %v2247_v10 }
 0x4dd   : > { %v2262_v40 = vmul.f32 1.442695, %v2246_v38 }
 0x4de   : > { %3139 = vpow2.f32 %v2264_v45 }
 0x4df   : > { %3141 = vpow2.f32 %v2262_v40 }
 0x4e8   : > { %v3140_v48 = vpop.eup %3139 }
 0x4e9   : > { %v3142_v14 = vpop.eup %3141  ;;  %v2688_v29 = vadd.f32 -1.0, %v3140_v48 }
 0x4ea   : > { %v2687_v43 = vadd.f32 -1.0, %v3142_v14 }
 0x4eb   : > { %v2311_v46 = vsel %vm2231_vm0, %v2917_v7, %v2688_v29 }
 0x4ec   : > { %v2327_v16 = vsel %vm554_vm1, %v2311_v46, 0.0  ;;  %v2310_v47 = vsel %vm2230_vm6, %v1654_v8, %v2687_v43 }
 0x4ed   : > { %v2326_v58 = vsel %vm554_vm1, %v2310_v47, 0.0 }
 0x4ee   : > { %v2328_v0 = vadd.f32 %v2327_v16, %v2326_v58 }
 0x4f0   : > { %v2924_v49 = vpop.f32.mrb[18].mxu0  ;;  %v2329_v19 = vrot.slane %v2328_v0, 4 }
 0x4f1   : > { %v2249_v25 = vmin.f32 %v2924_v49, 0.0  ;;  %v1735_v3 = vpop.f32.mrb[19].mxu0  ;;  %vm2233_vm7 = vcmp.gt.f32.partialorder %v2924_v49, 0.0 }
 0x4f2   : > { %v2248_v50 = vmin.f32 %v1735_v3, 0.0  ;;  %v2330_v55 = vadd.f32 %v2329_v19, %v2328_v0  ;;  %vm2232_vm9 = vcmp.gt.f32.partialorder %v1735_v3, 0.0 }
 0x4f3   : > { %v2268_v4 = vmul.f32 1.442695, %v2249_v25 }
 0x4f4   : > { %v2266_v53 = vmul.f32 1.442695, %v2248_v50  ;;  %v2931_v15 = vpop.f32.mrb[20].mxu0  ;;  %v2331_v27 = vrot.slane %v2330_v55, 2 }
 0x4f5   : > { %3143 = vpow2.f32 %v2268_v4  ;;  %v2251_v17 = vmin.f32 %v2931_v15, 0.0  ;;  %v1816_v23 = vpop.f32.mrb[21].mxu0  ;;  %vm2235_vm11 = vcmp.gt.f32.partialorder %v2931_v15, 0.0 }
 0x4f6   : > { %3145 = vpow2.f32 %v2266_v53  ;;  %v2250_v20 = vmin.f32 %v1816_v23, 0.0  ;;  %v2332_v56 = vadd.f32 %v2331_v27, %v2330_v55  ;;  %vm2234_vm10 = vcmp.gt.f32.partialorder %v1816_v23, 0.0 }
 0x4f7   : > { %v2272_v57 = vmul.f32 1.442695, %v2251_v17 }
 0x4f8   : > { %v2270_v59 = vmul.f32 1.442695, %v2250_v20  ;;  %v3906_v41 = vpop.f32.mrb[22].mxu0  ;;  %v2333_v11 = vrot.slane %v2332_v56, 1 }
 0x4f9   : > { %3147 = vpow2.f32 %v2272_v57  ;;  %v2253_v34 = vmin.f32 %v3906_v41, 0.0  ;;  %v3909_v61 = vpop.f32.mrb[23].mxu0  ;;  %vm2237_vm12 = vcmp.gt.f32.partialorder %v3906_v41, 0.0 }
 0x4fa   : > { %3149 = vpow2.f32 %v2270_v59  ;;  %v2252_v2 = vmin.f32 %v3909_v61, 0.0  ;;  %v3929_v42 = vadd.f32 %v2333_v11, %v2332_v56  ;;  %vm2236_vm13 = vcmp.gt.f32.partialorder %v3909_v61, 0.0 }
 0x4fb   : > { %v2276_v21 = vmul.f32 1.442695, %v2253_v34 }
 0x4fc   : > { %v2274_v5 = vmul.f32 1.442695, %v2252_v2  ;;  %v3912_v44 = vpop.f32.mrb[24].mxu0 }
 0x4fd   : > { %3151 = vpow2.f32 %v2276_v21  ;;  %v2255_v54 = vmin.f32 %v3912_v44, 0.0  ;;  %v3915_v6 = vpop.f32.mrb[25].mxu0  ;;  %vm2239_vm15 = vcmp.gt.f32.partialorder %v3912_v44, 0.0 }
 0x4fe   : > { %3153 = vpow2.f32 %v2274_v5  ;;  %v2254_v9 = vmin.f32 %v3915_v6, 0.0  ;;  %vm2238_vm2 = vcmp.gt.f32.partialorder %v3915_v6, 0.0 }
 0x4ff   : > { %v3144_v60 = vpop.eup %3143  ;;  %v2280_v30 = vmul.f32 1.442695, %v2255_v54 }
 0x500   : > { %v3146_v1 = vpop.eup %3145  ;;  %v2690_v22 = vadd.f32 -1.0, %v3144_v60  ;;  %v2278_v12 = vmul.f32 1.442695, %v2254_v9  ;;  %v3918_v63 = vpop.f32.mrb[26].mxu0 }
 0x501   : > { %v2689_v33 = vadd.f32 -1.0, %v3146_v1  ;;  %3155 = vpow2.f32 %v2280_v30  ;;  %v2257_v13 = vmin.f32 %v3918_v63, 0.0  ;;  %v3921_v62 = vpop.f32.mrb[27].mxu0  ;;  %vm2241_vm3 = vcmp.gt.f32.partialorder %v3918_v63, 0.0 }
 0x502   : > { %v2313_v35 = vsel %vm2233_vm7, %v2924_v49, %v2690_v22  ;;  %3157 = vpow2.f32 %v2278_v12  ;;  %v2256_v28 = vmin.f32 %v3921_v62, 0.0  ;;  %vm2240_vm4 = vcmp.gt.f32.partialorder %v3921_v62, 0.0 }
 0x503   : > { %v3148_v24 = vpop.eup %3147  ;;  %v2336_v36 = vsel %vm554_vm1, %v2313_v35, 0.0  ;;  %v2312_v26 = vsel %vm2232_vm9, %v1735_v3, %v2689_v33  ;;  %v2284_v18 = vmul.f32 1.442695, %v2257_v13  ;;  %vm2420_vm9 = vcmask 1044484  }
 0x504   : > { %v3150_v31 = vpop.eup %3149  ;;  %v2335_v32 = vsel %vm554_vm1, %v2312_v26, 0.0  ;;  %v2692_v39 = vadd.f32 -1.0, %v3148_v24  ;;  %v2282_v51 = vmul.f32 1.442695, %v2256_v28  ;;  %v3927_v52 = vpop.f32.mrb[28].mxu0 }
 0x505   : > { %v2337_v37 = vadd.f32 %v2336_v36, %v2335_v32  ;;  %v2691_v7 = vadd.f32 -1.0, %v3150_v31  ;;  %3159 = vpow2.f32 %v2284_v18  ;;  %v3931_v10 = vpop.f32.mrb[29].mxu0  ;;  %v2259_v38 = vmin.f32 %v3927_v52, 0.0 }
 0x506   : > { %v2315_v8 = vsel %vm2235_vm11, %v2931_v15, %v2692_v39  ;;  %3161 = vpow2.f32 %v2282_v51  ;;  %v2258_v29 = vmin.f32 %v3931_v10, 0.0  ;;  %vm2243_vm0 = vcmp.gt.f32.partialorder %v3927_v52, 0.0 }
 0x507   : > { %v3152_v45 = vpop.eup %3151  ;;  %v2338_v40 = vrot.slane %v2337_v37, 4  ;;  %v2345_v48 = vsel %vm554_vm1, %v2315_v8, 0.0  ;;  %v2314_v14 = vsel %vm2234_vm10, %v1816_v23, %v2691_v7  ;;  %v2288_v47 = vmul.f32 1.442695, %v2259_v38 }
 0x508   : > { %v3154_v43 = vpop.eup %3153  ;;  %v2344_v46 = vsel %vm554_vm1, %v2314_v14, 0.0  ;;  %v2694_v16 = vadd.f32 -1.0, %v3152_v45  ;;  %v3941_v58 = vpop.f32.mrb[30].mxu0  ;;  %v2286_v25 = vmul.f32 1.442695, %v2258_v29  ;;  %vm2242_vm6 = vcmp.gt.f32.partialorder %v3931_v10, 0.0 }
 0x509   : > { %v2339_v0 = vadd.f32 %v2338_v40, %v2337_v37  ;;  %v2346_v49 = vadd.f32 %v2345_v48, %v2344_v46  ;;  %v2693_v19 = vadd.f32 -1.0, %v3154_v43  ;;  %v3943_v3 = vpop.f32.mrb[31].mxu0  ;;  %3163 = vpow2.f32 %v2288_v47 }
 0x50a   : > { %v2317_v50 = vsel %vm2237_vm12, %v3906_v41, %v2694_v16  ;;  %v2261_v4 = vmin.f32 %v3941_v58, 0.0  ;;  %3165 = vpow2.f32 %v2286_v25  ;;  %v2260_v56 = vmin.f32 %v3943_v3, 0.0 }
 0x50b   : > { %v3156_v53 = vpop.eup %3155  ;;  %v2340_v15 = vrot.slane %v2339_v0, 2  ;;  %v2347_v55 = vrot.slane %v2346_v49, 4  ;;  %v2354_v17 = vsel %vm554_vm1, %v2317_v50, 0.0  ;;  %v2316_v23 = vsel %vm2236_vm13, %v3909_v61, %v2693_v19 }
 0x50c   : > { %v3158_v20 = vpop.eup %3157  ;;  %v2353_v57 = vsel %vm554_vm1, %v2316_v23, 0.0  ;;  %v2696_v59 = vadd.f32 -1.0, %v3156_v53  ;;  %v2292_v41 = vmul.f32 1.442695, %v2261_v4  ;;  %vm2245_vm7 = vcmp.gt.f32.partialorder %v3941_v58, 0.0 }
 0x50d   : > { %v2341_v27 = vadd.f32 %v2340_v15, %v2339_v0  ;;  %v2348_v34 = vadd.f32 %v2347_v55, %v2346_v49  ;;  %v2355_v2 = vadd.f32 %v2354_v17, %v2353_v57  ;;  %v2695_v21 = vadd.f32 -1.0, %v3158_v20 }
 0x50e   : > { %v2319_v5 = vsel %vm2239_vm15, %v3912_v44, %v2696_v59  ;;  %3167 = vpow2.f32 %v2292_v41  ;;  %v2290_v44 = vmul.f32 1.442695, %v2260_v56  ;;  %vm2244_vm11 = vcmp.gt.f32.partialorder %v3943_v3, 0.0 }
 0x50f   : > { %v3160_v61 = vpop.eup %3159  ;;  %v2342_v54 = vrot.slane %v2341_v27, 1  ;;  %v2349_v9 = vrot.slane %v2348_v34, 2  ;;  %v2356_v60 = vrot.slane %v2355_v2, 4  ;;  %v2363_v30 = vsel %vm554_vm1, %v2319_v5, 0.0 }
 0x510   : > { %v3162_v1 = vpop.eup %3161  ;;  %v2318_v22 = vsel %vm2238_vm2, %v3915_v6, %v2695_v21  ;;  %v2698_v12 = vadd.f32 -1.0, %v3160_v61  ;;  %3169 = vpow2.f32 %v2290_v44  ;;  %vm2422_vm10 = vcmask 1045509  }
 0x511   : > { %v2343_v11 = vadd.f32 %v2342_v54, %v2341_v27  ;;  %v2350_v33 = vadd.f32 %v2349_v9, %v2348_v34  ;;  %v2357_v13 = vadd.f32 %v2356_v60, %v2355_v2  ;;  %v2362_v35 = vsel %vm554_vm1, %v2318_v22, 0.0 }
 0x512   : > { %v2364_v28 = vadd.f32 %v2363_v30, %v2362_v35  ;;  %v2321_v24 = vsel %vm2241_vm3, %v3918_v63, %v2698_v12  ;;  %v2697_v36 = vadd.f32 -1.0, %v3162_v1  ;;  %vm2424_vm12 = vcmask 1046534  }
 0x513   : > { %v2415_v26 = vsel %vm2414_vm14, %v2343_v11, %v3929_v42  ;;  %v2351_v6 = vrot.slane %v2350_v33, 1  ;;  %v2358_v18 = vrot.slane %v2357_v13, 2  ;;  %v2372_v31 = vsel %vm554_vm1, %v2321_v24, 0.0  ;;  %v3164_v32 = vpop.eup %3163 }
 0x514   : > { %v2365_v39 = vrot.slane %v2364_v28, 4  ;;  %v2320_v51 = vsel %vm2240_vm4, %v3921_v62, %v2697_v36  ;;  %v2700_v8 = vadd.f32 -1.0, %v3164_v32  ;;  %v3166_v38 = vpop.eup %3165  ;;  %vm2426_vm13 = vcmask 1047559  }
 0x515   : > { %v2352_v37 = vadd.f32 %v2351_v6, %v2350_v33  ;;  %v2359_v7 = vadd.f32 %v2358_v18, %v2357_v13  ;;  %v2371_v63 = vsel %vm554_vm1, %v2320_v51, 0.0  ;;  %v2699_v29 = vadd.f32 -1.0, %v3166_v38  ;;  %v2703_v13 = vld [vmem:[%s4048_s6] ss:$0 sm:$0xff] }
 0x516   : > { %v2366_v45 = vadd.f32 %v2365_v39, %v2364_v28  ;;  %v2373_v42 = vadd.f32 %v2372_v31, %v2371_v63  ;;  %v2323_v14 = vsel %vm2243_vm0, %v3927_v52, %v2700_v8 }
 0x517   : > { %v2417_v40 = vsel %vm2416_vm5, %v2352_v37, %v2415_v26  ;;  %v2360_v48 = vrot.slane %v2359_v7, 1  ;;  %v2381_v62 = vsel %vm554_vm1, %v2323_v14, 0.0  ;;  %v2322_v0 = vsel %vm2242_vm6, %v3931_v10, %v2699_v29 }
 0x518   : > { %v3168_v43 = vpop.eup %3167  ;;  %v2367_v46 = vrot.slane %v2366_v45, 2  ;;  %v2374_v16 = vrot.slane %v2373_v42, 4  ;;  %v2380_v50 = vsel %vm554_vm1, %v2322_v0, 0.0 }
 0x519   : > { %v2361_v47 = vadd.f32 %v2360_v48, %v2359_v7  ;;  %v2702_v49 = vadd.f32 -1.0, %v3168_v43  ;;  %v2382_v4 = vadd.f32 %v2381_v62, %v2380_v50 }
 0x51a   : > { %v2368_v19 = vadd.f32 %v2367_v46, %v2366_v45  ;;  %v2375_v25 = vadd.f32 %v2374_v16, %v2373_v42  ;;  %v3170_v15 = vpop.eup %3169 }
 0x51b   : > { %v2419_v52 = vsel %vm2418_vm8, %v2361_v47, %v2417_v40  ;;  %v2325_v53 = vsel %vm2245_vm7, %v3941_v58, %v2702_v49  ;;  %v2383_v23 = vrot.slane %v2382_v4, 4  ;;  %v2701_v20 = vadd.f32 -1.0, %v3170_v15 }
 0x51c   : > { %v2369_v55 = vrot.slane %v2368_v19, 1  ;;  %v2376_v17 = vrot.slane %v2375_v25, 2  ;;  %v2390_v59 = vsel %vm554_vm1, %v2325_v53, 0.0 }
 0x51d   : > { %v2384_v41 = vadd.f32 %v2383_v23, %v2382_v4  ;;  %v2324_v27 = vsel %vm2244_vm11, %v3943_v3, %v2701_v20 }
 0x51e   : > { %v2370_v57 = vadd.f32 %v2369_v55, %v2368_v19  ;;  %v2377_v10 = vadd.f32 %v2376_v17, %v2375_v25  ;;  %v2389_v2 = vsel %vm554_vm1, %v2324_v27, 0.0 }
 0x51f   : > { %v2385_v58 = vrot.slane %v2384_v41, 2  ;;  %v2391_v5 = vadd.f32 %v2390_v59, %v2389_v2 }
 0x520   : > { %v2378_v34 = vrot.slane %v2377_v10, 1  ;;  %v2421_v21 = vsel %vm2420_vm9, %v2370_v57, %v2419_v52 }
 0x521   : > { %v2386_v61 = vadd.f32 %v2385_v58, %v2384_v41  ;;  %v2392_v54 = vrot.slane %v2391_v5, 4 }
 0x522   : > { %v2379_v56 = vadd.f32 %v2378_v34, %v2377_v10 }
 0x523   : > { %v2387_v60 = vrot.slane %v2386_v61, 1  ;;  %v2393_v30 = vadd.f32 %v2392_v54, %v2391_v5 }
 0x524   : > { %v2423_v9 = vsel %vm2422_vm10, %v2379_v56, %v2421_v21 }
 0x525   : > { %v2388_v1 = vadd.f32 %v2387_v60, %v2386_v61  ;;  %v2394_v22 = vrot.slane %v2393_v30, 2 }
 0x527   : > { %v2395_v12 = vadd.f32 %v2394_v22, %v2393_v30  ;;  %v2425_v3 = vsel %vm2424_vm12, %v2388_v1, %v2423_v9 }
 0x529   : > { %v2396_v44 = vrot.slane %v2395_v12, 1 }
 0x52b   : > { %v2397_v11 = vadd.f32 %v2396_v44, %v2395_v12 }
 0x52d   : > { %v2427_v33 = vsel %vm2426_vm13, %v2397_v11, %v2425_v3 }
 0x52e   : > { %2970 = vmatmul.mubr.msk.f32.vlgmr.msra.gmra.mrb[32].mxu1 %vm554_vm1, %v2427_v33 }
 0x601   : > { %v2496_v35 = vpop.f32.mrb[32].mxu1 }
 0x602   : > { %v2497_v28 = vadd.f32 %v2703_v13, %v2496_v35  ;;  %v2971_v24 = vpop.f32.mrb[33].mxu1 }
 0x604   : > { %2500 = vst [vmem:[%s338_s23] sm:$0xff] %v2497_v28 }
 0x605   : > { %3244 = shalt.err (!%p3241_p3)
}
 0x606   : > { %s3245_s11 = scalar_lea.hbm %s3998_s21, 128  ;;  %s3249_s17 = scalar_lea.hbm %s4049_s7, 256 }
 0x607   : > { %p3246_p12 = scmp.ne.s32.totalorder %s3998_s21, %s3245_s11  ;;  %p3250_p2 = scmp.lt.u32.totalorder %s3998_s21, %s4049_s7 }
 0x608   : > { %p3251_p4 = scmp.lt.u32.totalorder %s3249_s17, %s3245_s11  ;;  %p3253_p13 = scmp.lt.u32.totalorder %s3245_s11, %s3998_s21 }
 0x609   : > { %p3247_p8 = pnand %p3246_p12, %p4062_p1 }
 0x60a   : > { %p3252_p6 = por %p3251_p4, %p3250_p2 }
 0x60b   : > { %p3248_p0 = pneg %p3247_p8 }
 0x60c   : > { %p3254_p11 = por %p3253_p13, %p3252_p6 }
 0x60e   : > { %p3255_p10 = pnand %p3254_p11, %p3248_p0 }
 0x610   : > { %3258 = shalt.err (!%p3255_p10)
}
 0x611   : > { %3019 = dma.vmem_to_hbm [thread:$0]  (%p4062_p1), %s4000_s18, 128, %s3998_s21, %s2502_s12  }
 0x612 PF: > { %s2527_s15 = sand.u32 1, %s3289_s24   ;;  %p4063_p5 = scmp.ne.s32.totalorder %s4057_s14, 0 }
 0x613   : > { %p4064_p7 = scmp.ge.s32.totalorder %s3301_s27, 2  ;;  %s2528_s23 = scalar_lea.sflag [#allocation4], %s2527_s15 }
 0x615   : > { %p3029_p9 = pnand %p4064_p7, %p4063_p5 }
 0x617   : > { %3284 = dma.done.wait (!%p3029_p9), %s2528_s23, 128  }
 0x618   : > { %3286 = vsyncadd (!%p3029_p9), %s2528_s23, 4294967168  ;;  %s4065_s9 = sld [smem:[#allocation11_spill]]  ;;  %p23_p3 = scmp.ge.s32.totalorder %s3378_s30, 4  }
 0x619   : > { %s4066_s24 = smov %s3293_s25  ;;  %s4067_s25 = smov %s3297_s26 }
 0x61a   : > { %s4069_s27 = smov %s3378_s30  ;;  %25 = sbr.rel (!%p23_p3) target bundleno = 9 (0x9), region = 106 }
 0x61e   : > { %s4068_s26 = smov %s4065_s9 }
 0x621   :  { %2533 = vsyncpa [#allocation3], 1 }
 0x622   :  { %2535 = vsyncpa [#allocation3 + $0x1], 1 }
 0x623   :  { %2536 = vsyncpa [#allocation6], 1 }
 0x624   :  { %2538 = vsyncpa [#allocation6 + $0x1], 1 }
 0x625   :  { %2539 = vsyncpa [#allocation4], 1 }
 0x626   :  { %2541 = vsyncpa [#allocation4 + $0x1], 1 }

</bundles_post_ra>
